<compile_context>
chip_gen: v5e
topology: v5e:2x2
jax: 0.10.0
libtpu: 0.0.40
codegen_flags: <defaults>
</compile_context>

<pallas_src>
import math

import jax
import jax.numpy as jnp
from jax.experimental import pallas as pl
from jax.experimental.pallas import tpu as pltpu

# ---------------- config (small, consistent with the module's forward) -------
B = 2            # batch
C = 3            # image channels (ViT default)
IMG = 16         # image height = width
PATCH = 8        # patch size -> 2x2 = 4 patches
NP = (IMG // PATCH) ** 2
SEQ = NP + 1     # +CLS token -> 5
HID = 32         # hidden_size
HEADS = 4
DH = HID // HEADS
INTER = 64       # intermediate (MLP) size
LAYERS = 2
NUM_LABELS = 10
EPS = 1e-12      # HF ViT layer_norm_eps
PD = C * PATCH * PATCH   # flattened patch dim = 192
PADN = 128               # classifier output padded to a lane-dense 128

# ---------------- packed-slab layout ------------------------------------------
MISC_ROWS = 8                                  # SEQ base rows + lnf g/b + cls bias
ROW_LNFG, ROW_LNFB, ROW_BC = SEQ, SEQ + 1, SEQ + 2
VEC_ROWS = 8                                   # one row per per-layer 1xN vector
(VROW_LN1G, VROW_LN1B, VROW_BQKV, VROW_BO,
 VROW_LN2G, VROW_LN2B, VROW_BFC1, VROW_BFC2) = range(VEC_ROWS)
W_ROWS, W_LANES = 64, 512                      # per-layer bf16 weight slab
OFF_QKV, OFF_FC1, OFF_WO, OFF_FC2 = 0, 128, 256, 384   # lane-aligned sub-blocks


# ---------------- small in-kernel helpers ------------------------------------
def _layernorm(h, g, b):
    mu = jnp.mean(h, axis=-1, keepdims=True)
    var = jnp.mean((h - mu) ** 2, axis=-1, keepdims=True)
    return (h - mu) * jax.lax.rsqrt(var + EPS) * g + b


def _gelu(x):
    # TODO(synk): tanh-form GELU (EUP tanh + a few VPU muls); HF ViT's default is
    # the exact erf GELU, so outputs differ from the reference at ~1e-3 abs.
    c = math.sqrt(2.0 / math.pi)
    return 0.5 * x * (1.0 + jnp.tanh(c * (x + 0.044715 * x * x * x)))


# ---------------- the fused per-image forward kernel --------------------------
def _vit_fused_kernel(patches_ref, misc_ref, vecs_ref, wp_ref, wbig_ref, wc_ref,
                      out_ref):
    bf16, f32 = jnp.bfloat16, jnp.float32

    misc = misc_ref[...]                                   # (8, 128) f32
    base = misc[0:SEQ, 0:HID]                              # CLS + pos + conv-bias table
    lnfg = misc[ROW_LNFG:ROW_LNFG + 1, 0:HID]
    lnfb = misc[ROW_LNFB:ROW_LNFB + 1, 0:HID]
    bc = misc[ROW_BC:ROW_BC + 1, :]                        # (1, 128) padded classifier bias

    # --- patch embedding (conv-as-GEMM); CLS row of patches is zero, so the
    #     single GEMM also covers the CLS position (0 @ W = 0) and `base` adds
    #     the CLS token embedding / position embedding / conv bias.
    x = jnp.dot(patches_ref[...].astype(bf16), wp_ref[...],
                preferred_element_type=f32) + base         # (SEQ, HID) f32

    for li in range(LAYERS):      # static unroll; weights stay resident in VMEM
        V = vecs_ref[li]                                   # (8, 128) f32
        ln1g = V[VROW_LN1G:VROW_LN1G + 1, 0:HID]
        ln1b = V[VROW_LN1B:VROW_LN1B + 1, 0:HID]
        bqkv = V[VROW_BQKV:VROW_BQKV + 1, 0:3 * HID]
        bo = V[VROW_BO:VROW_BO + 1, 0:HID]
        ln2g = V[VROW_LN2G:VROW_LN2G + 1, 0:HID]
        ln2b = V[VROW_LN2B:VROW_LN2B + 1, 0:HID]
        bfc1 = V[VROW_BFC1:VROW_BFC1 + 1, 0:INTER]
        bfc2 = V[VROW_BFC2:VROW_BFC2 + 1, 0:HID]

        W = wbig_ref[li]                                   # (64, 512) bf16
        wqkv = W[0:HID, OFF_QKV:OFF_QKV + 3 * HID]         # (HID, 3*HID)
        wfc1 = W[0:HID, OFF_FC1:OFF_FC1 + INTER]           # (HID, INTER)
        wo = W[0:HID, OFF_WO:OFF_WO + HID]                 # (HID, HID)
        wfc2 = W[0:INTER, OFF_FC2:OFF_FC2 + HID]           # (INTER, HID)

        # --- LN1 + fused QKV projection (one wide matmul, N = 3*HID) ----------
        h1 = _layernorm(x, ln1g, ln1b)
        qkv = jnp.dot(h1.astype(bf16), wqkv,
                      preferred_element_type=f32) + bqkv   # (SEQ, 3*HID)
        # (1/sqrt(DH) is pre-folded into the Q columns of Wqkv / bqkv.)

        # --- per-head attention entirely on register values (no VMEM scratch) -
        ctx_parts = []
        for h in range(HEADS):
            qh = qkv[:, 0 * HID + h * DH:0 * HID + (h + 1) * DH]   # (SEQ, DH)
            kh = qkv[:, 1 * HID + h * DH:1 * HID + (h + 1) * DH]
            vh = qkv[:, 2 * HID + h * DH:2 * HID + (h + 1) * DH]
            s = jax.lax.dot_general(qh.astype(bf16), kh.astype(bf16),
                                    (((1,), (1,)), ((), ())),
                                    preferred_element_type=f32)    # (SEQ, SEQ)
            s = s - jnp.max(s, axis=-1, keepdims=True)
            e = jnp.exp(s)
            p = e * pl.reciprocal(jnp.sum(e, axis=-1, keepdims=True), approx=True)
            ctx_parts.append(jnp.dot(p.astype(bf16), vh.astype(bf16),
                                     preferred_element_type=f32))  # (SEQ, DH)

        # --- concat heads as a value, single wide Wo matmul, residual 1 -------
        ctx = jnp.concatenate(ctx_parts, axis=-1)          # (SEQ, HID)
        x = x + jnp.dot(ctx.astype(bf16), wo,
                        preferred_element_type=f32) + bo

        # --- LN2 + MLP (tanh GELU), residual 2 ---------------------------------
        h2 = _layernorm(x, ln2g, ln2b)
        f = jnp.dot(h2.astype(bf16), wfc1,
                    preferred_element_type=f32) + bfc1     # (SEQ, INTER)
        f = _gelu(f)
        x = x + jnp.dot(f.astype(bf16), wfc2,
                        preferred_element_type=f32) + bfc2

    # --- final LN + classifier on the CLS row (row 0); lane+sublane-dense store
    cls = _layernorm(x[0:1, :], lnfg, lnfb)                # (1, HID)
    logits = jnp.dot(cls.astype(bf16), wc_ref[...],
                     preferred_element_type=f32) + bc      # (1, PADN)
    out_ref[...] = jnp.broadcast_to(logits, (8, PADN))     # full (8,128) tile store


# ---------------- glue: patch extraction, params, packing --------------------
def extract_patches(x):
    # x: (B, C, IMG, IMG) NCHW -> (B, NP, C*PATCH*PATCH), matching the
    # flattening of the conv weight (HID, C, P, P).
    Bn = x.shape[0]
    p = x.reshape(Bn, C, IMG // PATCH, PATCH, IMG // PATCH, PATCH)
    p = p.transpose(0, 2, 4, 1, 3, 5)                   # (B, gh, gw, C, P, P)
    return p.reshape(Bn, NP, PD)


def init_params(key):
    ks = jax.random.split(key, 8 + LAYERS)
    scale = 0.02
    # conv weight (HID, C, P, P) flattened -> (PD, HID) for the GEMM
    w_conv = jax.random.normal(ks[0], (HID, C, PATCH, PATCH), jnp.float32) * scale
    params = {
        "patch_w": w_conv.reshape(HID, PD).T,
        "patch_b": jnp.zeros((1, HID), jnp.float32),
        "cls": jax.random.normal(ks[1], (1, 1, HID), jnp.float32) * scale,
        "pos": jax.random.normal(ks[2], (1, SEQ, HID), jnp.float32) * scale,
        "ln_f_g": jnp.ones((1, HID), jnp.float32),
        "ln_f_b": jnp.zeros((1, HID), jnp.float32),
        "cls_w": jax.random.normal(ks[3], (HID, NUM_LABELS), jnp.float32) * scale,
        "cls_b": jnp.zeros((1, NUM_LABELS), jnp.float32),
        "layers": [],
    }
    for li in range(LAYERS):
        lk = jax.random.split(ks[8 + li], 4)
        layer = (
            jnp.ones((1, HID), jnp.float32),                                # ln1 gamma
            jnp.zeros((1, HID), jnp.float32),                               # ln1 beta
            jax.random.normal(lk[0], (HID, 3 * HID), jnp.float32) * scale,  # Wqkv
            jnp.zeros((1, 3 * HID), jnp.float32),                           # bqkv
            jax.random.normal(lk[1], (HID, HID), jnp.float32) * scale,      # Wo
            jnp.zeros((1, HID), jnp.float32),                               # bo
            jnp.ones((1, HID), jnp.float32),                                # ln2 gamma
            jnp.zeros((1, HID), jnp.float32),                               # ln2 beta
            jax.random.normal(lk[2], (HID, INTER), jnp.float32) * scale,    # Wfc1
            jnp.zeros((1, INTER), jnp.float32),                             # bfc1
            jax.random.normal(lk[3], (INTER, HID), jnp.float32) * scale,    # Wfc2
            jnp.zeros((1, HID), jnp.float32),                               # bfc2
        )
        params["layers"].append(layer)
    return params


def pack_params(params):
    """One-time glue: consolidate all small parameters into a few slabs so the
    kernel takes 6 inputs instead of 20, fold 1/sqrt(DH) into the Q projection,
    fold cls/pos/conv-bias into one additive table, cast MXU weights to bf16,
    pad the classifier to 128 lanes."""
    bf16 = jnp.bfloat16
    q_scale = 1.0 / math.sqrt(DH)

    # --- misc slab: base table (rows 0:SEQ), final-LN params, classifier bias --
    pos = params["pos"][0]                                   # (SEQ, HID)
    row0 = pos[0:1, :] + params["cls"][0, 0][None, :]        # CLS row
    rows = pos[1:, :] + params["patch_b"]                    # patch rows
    base = jnp.concatenate([row0, rows], axis=0)             # (SEQ, HID)
    misc = jnp.zeros((MISC_ROWS, 128), jnp.float32)
    misc = misc.at[0:SEQ, :HID].set(base)
    misc = misc.at[ROW_LNFG, :HID].set(params["ln_f_g"][0])
    misc = misc.at[ROW_LNFB, :HID].set(params["ln_f_b"][0])
    misc = misc.at[ROW_BC, :NUM_LABELS].set(params["cls_b"][0])

    # --- per-layer vector slab and per-layer bf16 weight slab -------------------
    vecs = jnp.zeros((LAYERS, VEC_ROWS, 128), jnp.float32)
    wbig = jnp.zeros((LAYERS, W_ROWS, W_LANES), jnp.float32)
    for li, lp in enumerate(params["layers"]):
        (ln1g, ln1b, wqkv, bqkv, wo, bo,
         ln2g, ln2b, wfc1, bfc1, wfc2, bfc2) = lp
        wqkv = wqkv.at[:, :HID].multiply(q_scale)            # fold attn scale into Q
        bqkv = bqkv.at[:, :HID].multiply(q_scale)
        vecs = vecs.at[li, VROW_LN1G, :HID].set(ln1g[0])
        vecs = vecs.at[li, VROW_LN1B, :HID].set(ln1b[0])
        vecs = vecs.at[li, VROW_BQKV, :3 * HID].set(bqkv[0])
        vecs = vecs.at[li, VROW_BO, :HID].set(bo[0])
        vecs = vecs.at[li, VROW_LN2G, :HID].set(ln2g[0])
        vecs = vecs.at[li, VROW_LN2B, :HID].set(ln2b[0])
        vecs = vecs.at[li, VROW_BFC1, :INTER].set(bfc1[0])
        vecs = vecs.at[li, VROW_BFC2, :HID].set(bfc2[0])
        wbig = wbig.at[li, :HID, OFF_QKV:OFF_QKV + 3 * HID].set(wqkv)
        wbig = wbig.at[li, :HID, OFF_FC1:OFF_FC1 + INTER].set(wfc1)
        wbig = wbig.at[li, :HID, OFF_WO:OFF_WO + HID].set(wo)
        wbig = wbig.at[li, :INTER, OFF_FC2:OFF_FC2 + HID].set(wfc2)

    wc = jnp.zeros((HID, PADN), jnp.float32).at[:, :NUM_LABELS].set(params["cls_w"])

    return dict(
        misc=misc,
        vecs=vecs,
        wp=params["patch_w"].astype(bf16),
        wbig=wbig.astype(bf16),
        wc=wc.astype(bf16),
    )


# ---------------- cost estimate (advisory; ~0.5 MFLOP total) ------------------
_FLOPS = 2 * B * (
    SEQ * PD * HID
    + LAYERS * (SEQ * HID * 3 * HID + 2 * HEADS * SEQ * SEQ * DH
                + SEQ * HID * HID + 2 * SEQ * HID * INTER)
    + HID * PADN)
_TRANS = B * LAYERS * (HEADS * SEQ * SEQ + SEQ * INTER + 3 * SEQ) + 4 * B
_BYTES = (B * SEQ * PD * 4 + MISC_ROWS * 128 * 4 + LAYERS * VEC_ROWS * 128 * 4
          + PD * HID * 2 + LAYERS * W_ROWS * W_LANES * 2 + HID * PADN * 2
          + B * 8 * PADN * 4)


@jax.jit
def vit_forward(x, packed):
    patches = extract_patches(x)                                           # (B, NP, PD)
    # zero CLS row so the single GEMM also covers the CLS position (0 @ W = 0)
    patches = jnp.concatenate(
        [jnp.zeros((x.shape[0], 1, PD), patches.dtype), patches], axis=1)  # (B, SEQ, PD)

    out = pl.pallas_call(
        _vit_fused_kernel,
        out_shape=jax.ShapeDtypeStruct((B, 8, PADN), jnp.float32),
        grid=(B,),
        in_specs=[
            pl.BlockSpec((None, SEQ, PD), lambda b: (b, 0, 0)),            # patches
            pl.BlockSpec((MISC_ROWS, 128), lambda b: (0, 0)),              # misc slab
            pl.BlockSpec((LAYERS, VEC_ROWS, 128), lambda b: (0, 0, 0)),    # per-layer vectors
            pl.BlockSpec((PD, HID), lambda b: (0, 0)),                     # patch-embed weight
            pl.BlockSpec((LAYERS, W_ROWS, W_LANES), lambda b: (0, 0, 0)),  # per-layer weights
            pl.BlockSpec((HID, PADN), lambda b: (0, 0)),                   # classifier weight
        ],
        out_specs=pl.BlockSpec((None, 8, PADN), lambda b: (b, 0, 0)),
        compiler_params=pltpu.CompilerParams(
            dimension_semantics=("parallel",)),
        cost_estimate=pl.CostEstimate(
            flops=_FLOPS, transcendentals=_TRANS, bytes_accessed=_BYTES),
    )(patches, packed["misc"], packed["vecs"], packed["wp"],
      packed["wbig"], packed["wc"])

    return out[:, 0, :NUM_LABELS]                                          # (B, NUM_LABELS)


if __name__ == "__main__":
    key = jax.random.PRNGKey(0)
    kx, kp = jax.random.split(key)
    x = jax.random.normal(kx, (B, C, IMG, IMG), jnp.float32)   # NCHW like PyTorch
    params = init_params(kp)
    packed = pack_params(params)

    out = vit_forward(x, packed)
    out = jax.block_until_ready(out)
    assert out.shape == (B, NUM_LABELS), out.shape
    assert bool(jnp.all(jnp.isfinite(out)))
    print("KERNEL_OK")
</pallas_src>

<mosaic_0001>
module attributes {stable_mosaic.version = 11 : i64} {
  func.func @_vit_fused_kernel(%arg0: i32, %arg1: memref<1x5x192xf32, #tpu.memory_space<vmem>>, %arg2: memref<8x128xf32, #tpu.memory_space<vmem>>, %arg3: memref<2x8x128xf32, #tpu.memory_space<vmem>>, %arg4: memref<192x32xbf16, #tpu.memory_space<vmem>>, %arg5: memref<2x64x512xbf16, #tpu.memory_space<vmem>>, %arg6: memref<32x128xbf16, #tpu.memory_space<vmem>>, %arg7: memref<1x8x128xf32, #tpu.memory_space<vmem>>) attributes {dimension_semantics = [#tpu.dimension_semantics<parallel>], iteration_bounds = array<i64: 2>, scalar_prefetch = 0 : i64, scratch_operands = 0 : i64, tpu.core_type = #tpu.core_type<tc>, window_params = [{transform_indices = @transform_0, window_bounds = array<i64: 1, 5, 192>}, {pipeline_mode = #tpu.pipeline_mode<synchronous>, transform_indices = @transform_1, window_bounds = array<i64: 8, 128>}, {pipeline_mode = #tpu.pipeline_mode<synchronous>, transform_indices = @transform_2, window_bounds = array<i64: 2, 8, 128>}, {pipeline_mode = #tpu.pipeline_mode<synchronous>, transform_indices = @transform_3, window_bounds = array<i64: 192, 32>}, {pipeline_mode = #tpu.pipeline_mode<synchronous>, transform_indices = @transform_4, window_bounds = array<i64: 2, 64, 512>}, {pipeline_mode = #tpu.pipeline_mode<synchronous>, transform_indices = @transform_5, window_bounds = array<i64: 32, 128>}, {transform_indices = @transform_6, window_bounds = array<i64: 1, 8, 128>}]} {
    %c0 = arith.constant 0 : index
    %c0_0 = arith.constant 0 : index
    %0 = vector.load %arg2[%c0, %c0_0] : memref<8x128xf32, #tpu.memory_space<vmem>>, vector<8x128xf32>
    %1 = vector.extract_strided_slice %0 {offsets = [0, 0], sizes = [5, 32], strides = [1, 1]} : vector<8x128xf32> to vector<5x32xf32>
    %2 = vector.extract_strided_slice %0 {offsets = [5, 0], sizes = [1, 32], strides = [1, 1]} : vector<8x128xf32> to vector<1x32xf32>
    %3 = vector.extract_strided_slice %0 {offsets = [6, 0], sizes = [1, 32], strides = [1, 1]} : vector<8x128xf32> to vector<1x32xf32>
    %4 = vector.extract_strided_slice %0 {offsets = [7, 0], sizes = [1, 128], strides = [1, 1]} : vector<8x128xf32> to vector<1x128xf32>
    %c0_1 = arith.constant 0 : index
    %c0_2 = arith.constant 0 : index
    %c0_3 = arith.constant 0 : index
    %5 = vector.load %arg1[%c0_1, %c0_2, %c0_3] : memref<1x5x192xf32, #tpu.memory_space<vmem>>, vector<1x5x192xf32>
    %6 = vector.shape_cast %5 : vector<1x5x192xf32> to vector<5x192xf32>
    %7 = arith.truncf %6 : vector<5x192xf32> to vector<5x192xbf16>
    %c0_4 = arith.constant 0 : index
    %c0_5 = arith.constant 0 : index
    %8 = vector.load %arg4[%c0_4, %c0_5] : memref<192x32xbf16, #tpu.memory_space<vmem>>, vector<192x32xbf16>
    %cst = arith.constant dense<0.000000e+00> : vector<5x32xf32>
    %9 = tpu.matmul %7, %8, %cst {dimension_numbers = #tpu.dot_dimension_numbers<[1], [0], [0], [1], [0, 0, 1, 1], [], []>} : vector<5x192xbf16>, vector<192x32xbf16>, vector<5x32xf32> -> vector<5x32xf32>
    %10 = arith.addf %9, %1 : vector<5x32xf32>
    %c0_6 = arith.constant 0 : index
    %c0_7 = arith.constant 0 : index
    %c0_8 = arith.constant 0 : index
    %11 = vector.load %arg3[%c0_6, %c0_7, %c0_8] : memref<2x8x128xf32, #tpu.memory_space<vmem>>, vector<1x8x128xf32>
    %12 = vector.shape_cast %11 : vector<1x8x128xf32> to vector<8x128xf32>
    %13 = vector.extract_strided_slice %12 {offsets = [0, 0], sizes = [1, 32], strides = [1, 1]} : vector<8x128xf32> to vector<1x32xf32>
    %14 = vector.extract_strided_slice %12 {offsets = [1, 0], sizes = [1, 32], strides = [1, 1]} : vector<8x128xf32> to vector<1x32xf32>
    %15 = vector.extract_strided_slice %12 {offsets = [2, 0], sizes = [1, 96], strides = [1, 1]} : vector<8x128xf32> to vector<1x96xf32>
    %16 = vector.extract_strided_slice %12 {offsets = [3, 0], sizes = [1, 32], strides = [1, 1]} : vector<8x128xf32> to vector<1x32xf32>
    %17 = vector.extract_strided_slice %12 {offsets = [4, 0], sizes = [1, 32], strides = [1, 1]} : vector<8x128xf32> to vector<1x32xf32>
    %18 = vector.extract_strided_slice %12 {offsets = [5, 0], sizes = [1, 32], strides = [1, 1]} : vector<8x128xf32> to vector<1x32xf32>
    %19 = vector.extract_strided_slice %12 {offsets = [6, 0], sizes = [1, 64], strides = [1, 1]} : vector<8x128xf32> to vector<1x64xf32>
    %20 = vector.extract_strided_slice %12 {offsets = [7, 0], sizes = [1, 32], strides = [1, 1]} : vector<8x128xf32> to vector<1x32xf32>
    %c0_9 = arith.constant 0 : index
    %c0_10 = arith.constant 0 : index
    %c0_11 = arith.constant 0 : index
    %21 = vector.load %arg5[%c0_9, %c0_10, %c0_11] : memref<2x64x512xbf16, #tpu.memory_space<vmem>>, vector<1x64x512xbf16>
    %22 = vector.shape_cast %21 : vector<1x64x512xbf16> to vector<64x512xbf16>
    %23 = vector.extract_strided_slice %22 {offsets = [0, 0], sizes = [32, 96], strides = [1, 1]} : vector<64x512xbf16> to vector<32x96xbf16>
    %24 = vector.extract_strided_slice %22 {offsets = [0, 128], sizes = [32, 64], strides = [1, 1]} : vector<64x512xbf16> to vector<32x64xbf16>
    %25 = vector.extract_strided_slice %22 {offsets = [0, 256], sizes = [32, 32], strides = [1, 1]} : vector<64x512xbf16> to vector<32x32xbf16>
    %26 = vector.extract_strided_slice %22 {offsets = [0, 384], sizes = [64, 32], strides = [1, 1]} : vector<64x512xbf16> to vector<64x32xbf16>
    %cst_12 = arith.constant dense<0.000000e+00> : vector<5xf32>
    %27 = vector.multi_reduction <add>, %10, %cst_12 [1] : vector<5x32xf32> to vector<5xf32>
    %28 = vector.shape_cast %27 : vector<5xf32> to vector<5x1xf32>
    %cst_13 = arith.constant 3.200000e+01 : f32
    %29 = vector.broadcast %cst_13 : f32 to vector<5x1xf32>
    %30 = arith.divf %28, %29 : vector<5x1xf32>
    %31 = vector.broadcast %30 : vector<5x1xf32> to vector<5x32xf32>
    %32 = arith.subf %10, %31 : vector<5x32xf32>
    %33 = arith.mulf %32, %32 : vector<5x32xf32>
    %cst_14 = arith.constant dense<0.000000e+00> : vector<5xf32>
    %34 = vector.multi_reduction <add>, %33, %cst_14 [1] : vector<5x32xf32> to vector<5xf32>
    %35 = vector.shape_cast %34 : vector<5xf32> to vector<5x1xf32>
    %cst_15 = arith.constant 3.200000e+01 : f32
    %36 = vector.broadcast %cst_15 : f32 to vector<5x1xf32>
    %37 = arith.divf %35, %36 : vector<5x1xf32>
    %38 = vector.broadcast %30 : vector<5x1xf32> to vector<5x32xf32>
    %39 = arith.subf %10, %38 : vector<5x32xf32>
    %cst_16 = arith.constant 9.99999996E-13 : f32
    %40 = vector.broadcast %cst_16 : f32 to vector<5x1xf32>
    %41 = arith.addf %37, %40 : vector<5x1xf32>
    %42 = math.rsqrt %41 : vector<5x1xf32>
    %43 = vector.broadcast %42 : vector<5x1xf32> to vector<5x32xf32>
    %44 = arith.mulf %39, %43 : vector<5x32xf32>
    %45 = vector.broadcast %13 : vector<1x32xf32> to vector<5x32xf32>
    %46 = arith.mulf %44, %45 : vector<5x32xf32>
    %47 = vector.broadcast %14 : vector<1x32xf32> to vector<5x32xf32>
    %48 = arith.addf %46, %47 : vector<5x32xf32>
    %49 = arith.truncf %48 : vector<5x32xf32> to vector<5x32xbf16>
    %cst_17 = arith.constant dense<0.000000e+00> : vector<5x96xf32>
    %50 = tpu.matmul %49, %23, %cst_17 {dimension_numbers = #tpu.dot_dimension_numbers<[1], [0], [0], [1], [0, 0, 1, 1], [], []>} : vector<5x32xbf16>, vector<32x96xbf16>, vector<5x96xf32> -> vector<5x96xf32>
    %51 = vector.broadcast %15 : vector<1x96xf32> to vector<5x96xf32>
    %52 = arith.addf %50, %51 : vector<5x96xf32>
    %53 = vector.extract_strided_slice %52 {offsets = [0, 0], sizes = [5, 8], strides = [1, 1]} : vector<5x96xf32> to vector<5x8xf32>
    %54 = vector.extract_strided_slice %52 {offsets = [0, 32], sizes = [5, 8], strides = [1, 1]} : vector<5x96xf32> to vector<5x8xf32>
    %55 = vector.extract_strided_slice %52 {offsets = [0, 64], sizes = [5, 8], strides = [1, 1]} : vector<5x96xf32> to vector<5x8xf32>
    %56 = arith.truncf %53 : vector<5x8xf32> to vector<5x8xbf16>
    %57 = arith.truncf %54 : vector<5x8xf32> to vector<5x8xbf16>
    %cst_18 = arith.constant dense<0.000000e+00> : vector<5x5xf32>
    %58 = tpu.matmul %56, %57, %cst_18 {dimension_numbers = #tpu.dot_dimension_numbers<[1], [1], [0], [0], [0, 0, 1, 0], [], []>} : vector<5x8xbf16>, vector<5x8xbf16>, vector<5x5xf32> -> vector<5x5xf32>
    %cst_19 = arith.constant dense<0xFF800000> : vector<5xf32>
    %59 = vector.multi_reduction <maximumf>, %58, %cst_19 [1] : vector<5x5xf32> to vector<5xf32>
    %60 = vector.shape_cast %59 : vector<5xf32> to vector<5x1xf32>
    %61 = vector.broadcast %60 : vector<5x1xf32> to vector<5x5xf32>
    %62 = arith.subf %58, %61 : vector<5x5xf32>
    %63 = math.exp %62 : vector<5x5xf32>
    %cst_20 = arith.constant dense<0.000000e+00> : vector<5xf32>
    %64 = vector.multi_reduction <add>, %63, %cst_20 [1] : vector<5x5xf32> to vector<5xf32>
    %65 = vector.shape_cast %64 : vector<5xf32> to vector<5x1xf32>
    %66 = tpu.reciprocal %65 {approx = true} : vector<5x1xf32> -> vector<5x1xf32>
    %67 = vector.broadcast %66 : vector<5x1xf32> to vector<5x5xf32>
    %68 = arith.mulf %63, %67 : vector<5x5xf32>
    %69 = arith.truncf %68 : vector<5x5xf32> to vector<5x5xbf16>
    %70 = arith.truncf %55 : vector<5x8xf32> to vector<5x8xbf16>
    %cst_21 = arith.constant dense<0.000000e+00> : vector<5x8xf32>
    %71 = tpu.matmul %69, %70, %cst_21 {dimension_numbers = #tpu.dot_dimension_numbers<[1], [0], [0], [1], [0, 0, 1, 1], [], []>} : vector<5x5xbf16>, vector<5x8xbf16>, vector<5x8xf32> -> vector<5x8xf32>
    %72 = vector.extract_strided_slice %52 {offsets = [0, 8], sizes = [5, 8], strides = [1, 1]} : vector<5x96xf32> to vector<5x8xf32>
    %73 = vector.extract_strided_slice %52 {offsets = [0, 40], sizes = [5, 8], strides = [1, 1]} : vector<5x96xf32> to vector<5x8xf32>
    %74 = vector.extract_strided_slice %52 {offsets = [0, 72], sizes = [5, 8], strides = [1, 1]} : vector<5x96xf32> to vector<5x8xf32>
    %75 = arith.truncf %72 : vector<5x8xf32> to vector<5x8xbf16>
    %76 = arith.truncf %73 : vector<5x8xf32> to vector<5x8xbf16>
    %cst_22 = arith.constant dense<0.000000e+00> : vector<5x5xf32>
    %77 = tpu.matmul %75, %76, %cst_22 {dimension_numbers = #tpu.dot_dimension_numbers<[1], [1], [0], [0], [0, 0, 1, 0], [], []>} : vector<5x8xbf16>, vector<5x8xbf16>, vector<5x5xf32> -> vector<5x5xf32>
    %cst_23 = arith.constant dense<0xFF800000> : vector<5xf32>
    %78 = vector.multi_reduction <maximumf>, %77, %cst_23 [1] : vector<5x5xf32> to vector<5xf32>
    %79 = vector.shape_cast %78 : vector<5xf32> to vector<5x1xf32>
    %80 = vector.broadcast %79 : vector<5x1xf32> to vector<5x5xf32>
    %81 = arith.subf %77, %80 : vector<5x5xf32>
    %82 = math.exp %81 : vector<5x5xf32>
    %cst_24 = arith.constant dense<0.000000e+00> : vector<5xf32>
    %83 = vector.multi_reduction <add>, %82, %cst_24 [1] : vector<5x5xf32> to vector<5xf32>
    %84 = vector.shape_cast %83 : vector<5xf32> to vector<5x1xf32>
    %85 = tpu.reciprocal %84 {approx = true} : vector<5x1xf32> -> vector<5x1xf32>
    %86 = vector.broadcast %85 : vector<5x1xf32> to vector<5x5xf32>
    %87 = arith.mulf %82, %86 : vector<5x5xf32>
    %88 = arith.truncf %87 : vector<5x5xf32> to vector<5x5xbf16>
    %89 = arith.truncf %74 : vector<5x8xf32> to vector<5x8xbf16>
    %cst_25 = arith.constant dense<0.000000e+00> : vector<5x8xf32>
    %90 = tpu.matmul %88, %89, %cst_25 {dimension_numbers = #tpu.dot_dimension_numbers<[1], [0], [0], [1], [0, 0, 1, 1], [], []>} : vector<5x5xbf16>, vector<5x8xbf16>, vector<5x8xf32> -> vector<5x8xf32>
    %91 = vector.extract_strided_slice %52 {offsets = [0, 16], sizes = [5, 8], strides = [1, 1]} : vector<5x96xf32> to vector<5x8xf32>
    %92 = vector.extract_strided_slice %52 {offsets = [0, 48], sizes = [5, 8], strides = [1, 1]} : vector<5x96xf32> to vector<5x8xf32>
    %93 = vector.extract_strided_slice %52 {offsets = [0, 80], sizes = [5, 8], strides = [1, 1]} : vector<5x96xf32> to vector<5x8xf32>
    %94 = arith.truncf %91 : vector<5x8xf32> to vector<5x8xbf16>
    %95 = arith.truncf %92 : vector<5x8xf32> to vector<5x8xbf16>
    %cst_26 = arith.constant dense<0.000000e+00> : vector<5x5xf32>
    %96 = tpu.matmul %94, %95, %cst_26 {dimension_numbers = #tpu.dot_dimension_numbers<[1], [1], [0], [0], [0, 0, 1, 0], [], []>} : vector<5x8xbf16>, vector<5x8xbf16>, vector<5x5xf32> -> vector<5x5xf32>
    %cst_27 = arith.constant dense<0xFF800000> : vector<5xf32>
    %97 = vector.multi_reduction <maximumf>, %96, %cst_27 [1] : vector<5x5xf32> to vector<5xf32>
    %98 = vector.shape_cast %97 : vector<5xf32> to vector<5x1xf32>
    %99 = vector.broadcast %98 : vector<5x1xf32> to vector<5x5xf32>
    %100 = arith.subf %96, %99 : vector<5x5xf32>
    %101 = math.exp %100 : vector<5x5xf32>
    %cst_28 = arith.constant dense<0.000000e+00> : vector<5xf32>
    %102 = vector.multi_reduction <add>, %101, %cst_28 [1] : vector<5x5xf32> to vector<5xf32>
    %103 = vector.shape_cast %102 : vector<5xf32> to vector<5x1xf32>
    %104 = tpu.reciprocal %103 {approx = true} : vector<5x1xf32> -> vector<5x1xf32>
    %105 = vector.broadcast %104 : vector<5x1xf32> to vector<5x5xf32>
    %106 = arith.mulf %101, %105 : vector<5x5xf32>
    %107 = arith.truncf %106 : vector<5x5xf32> to vector<5x5xbf16>
    %108 = arith.truncf %93 : vector<5x8xf32> to vector<5x8xbf16>
    %cst_29 = arith.constant dense<0.000000e+00> : vector<5x8xf32>
    %109 = tpu.matmul %107, %108, %cst_29 {dimension_numbers = #tpu.dot_dimension_numbers<[1], [0], [0], [1], [0, 0, 1, 1], [], []>} : vector<5x5xbf16>, vector<5x8xbf16>, vector<5x8xf32> -> vector<5x8xf32>
    %110 = vector.extract_strided_slice %52 {offsets = [0, 24], sizes = [5, 8], strides = [1, 1]} : vector<5x96xf32> to vector<5x8xf32>
    %111 = vector.extract_strided_slice %52 {offsets = [0, 56], sizes = [5, 8], strides = [1, 1]} : vector<5x96xf32> to vector<5x8xf32>
    %112 = vector.extract_strided_slice %52 {offsets = [0, 88], sizes = [5, 8], strides = [1, 1]} : vector<5x96xf32> to vector<5x8xf32>
    %113 = arith.truncf %110 : vector<5x8xf32> to vector<5x8xbf16>
    %114 = arith.truncf %111 : vector<5x8xf32> to vector<5x8xbf16>
    %cst_30 = arith.constant dense<0.000000e+00> : vector<5x5xf32>
    %115 = tpu.matmul %113, %114, %cst_30 {dimension_numbers = #tpu.dot_dimension_numbers<[1], [1], [0], [0], [0, 0, 1, 0], [], []>} : vector<5x8xbf16>, vector<5x8xbf16>, vector<5x5xf32> -> vector<5x5xf32>
    %cst_31 = arith.constant dense<0xFF800000> : vector<5xf32>
    %116 = vector.multi_reduction <maximumf>, %115, %cst_31 [1] : vector<5x5xf32> to vector<5xf32>
    %117 = vector.shape_cast %116 : vector<5xf32> to vector<5x1xf32>
    %118 = vector.broadcast %117 : vector<5x1xf32> to vector<5x5xf32>
    %119 = arith.subf %115, %118 : vector<5x5xf32>
    %120 = math.exp %119 : vector<5x5xf32>
    %cst_32 = arith.constant dense<0.000000e+00> : vector<5xf32>
    %121 = vector.multi_reduction <add>, %120, %cst_32 [1] : vector<5x5xf32> to vector<5xf32>
    %122 = vector.shape_cast %121 : vector<5xf32> to vector<5x1xf32>
    %123 = tpu.reciprocal %122 {approx = true} : vector<5x1xf32> -> vector<5x1xf32>
    %124 = vector.broadcast %123 : vector<5x1xf32> to vector<5x5xf32>
    %125 = arith.mulf %120, %124 : vector<5x5xf32>
    %126 = arith.truncf %125 : vector<5x5xf32> to vector<5x5xbf16>
    %127 = arith.truncf %112 : vector<5x8xf32> to vector<5x8xbf16>
    %cst_33 = arith.constant dense<0.000000e+00> : vector<5x8xf32>
    %128 = tpu.matmul %126, %127, %cst_33 {dimension_numbers = #tpu.dot_dimension_numbers<[1], [0], [0], [1], [0, 0, 1, 1], [], []>} : vector<5x5xbf16>, vector<5x8xbf16>, vector<5x8xf32> -> vector<5x8xf32>
    %129 = tpu.concatenate %71, %90, %109, %128 in 1 : vector<5x8xf32>, vector<5x8xf32>, vector<5x8xf32>, vector<5x8xf32> -> vector<5x32xf32>
    %130 = arith.truncf %129 : vector<5x32xf32> to vector<5x32xbf16>
    %cst_34 = arith.constant dense<0.000000e+00> : vector<5x32xf32>
    %131 = tpu.matmul %130, %25, %cst_34 {dimension_numbers = #tpu.dot_dimension_numbers<[1], [0], [0], [1], [0, 0, 1, 1], [], []>} : vector<5x32xbf16>, vector<32x32xbf16>, vector<5x32xf32> -> vector<5x32xf32>
    %132 = arith.addf %10, %131 : vector<5x32xf32>
    %133 = vector.broadcast %16 : vector<1x32xf32> to vector<5x32xf32>
    %134 = arith.addf %132, %133 : vector<5x32xf32>
    %cst_35 = arith.constant dense<0.000000e+00> : vector<5xf32>
    %135 = vector.multi_reduction <add>, %134, %cst_35 [1] : vector<5x32xf32> to vector<5xf32>
    %136 = vector.shape_cast %135 : vector<5xf32> to vector<5x1xf32>
    %cst_36 = arith.constant 3.200000e+01 : f32
    %137 = vector.broadcast %cst_36 : f32 to vector<5x1xf32>
    %138 = arith.divf %136, %137 : vector<5x1xf32>
    %139 = vector.broadcast %138 : vector<5x1xf32> to vector<5x32xf32>
    %140 = arith.subf %134, %139 : vector<5x32xf32>
    %141 = arith.mulf %140, %140 : vector<5x32xf32>
    %cst_37 = arith.constant dense<0.000000e+00> : vector<5xf32>
    %142 = vector.multi_reduction <add>, %141, %cst_37 [1] : vector<5x32xf32> to vector<5xf32>
    %143 = vector.shape_cast %142 : vector<5xf32> to vector<5x1xf32>
    %cst_38 = arith.constant 3.200000e+01 : f32
    %144 = vector.broadcast %cst_38 : f32 to vector<5x1xf32>
    %145 = arith.divf %143, %144 : vector<5x1xf32>
    %146 = vector.broadcast %138 : vector<5x1xf32> to vector<5x32xf32>
    %147 = arith.subf %134, %146 : vector<5x32xf32>
    %cst_39 = arith.constant 9.99999996E-13 : f32
    %148 = vector.broadcast %cst_39 : f32 to vector<5x1xf32>
    %149 = arith.addf %145, %148 : vector<5x1xf32>
    %150 = math.rsqrt %149 : vector<5x1xf32>
    %151 = vector.broadcast %150 : vector<5x1xf32> to vector<5x32xf32>
    %152 = arith.mulf %147, %151 : vector<5x32xf32>
    %153 = vector.broadcast %17 : vector<1x32xf32> to vector<5x32xf32>
    %154 = arith.mulf %152, %153 : vector<5x32xf32>
    %155 = vector.broadcast %18 : vector<1x32xf32> to vector<5x32xf32>
    %156 = arith.addf %154, %155 : vector<5x32xf32>
    %157 = arith.truncf %156 : vector<5x32xf32> to vector<5x32xbf16>
    %cst_40 = arith.constant dense<0.000000e+00> : vector<5x64xf32>
    %158 = tpu.matmul %157, %24, %cst_40 {dimension_numbers = #tpu.dot_dimension_numbers<[1], [0], [0], [1], [0, 0, 1, 1], [], []>} : vector<5x32xbf16>, vector<32x64xbf16>, vector<5x64xf32> -> vector<5x64xf32>
    %159 = vector.broadcast %19 : vector<1x64xf32> to vector<5x64xf32>
    %160 = arith.addf %158, %159 : vector<5x64xf32>
    %cst_41 = arith.constant 5.000000e-01 : f32
    %161 = vector.broadcast %cst_41 : f32 to vector<5x64xf32>
    %162 = arith.mulf %161, %160 : vector<5x64xf32>
    %cst_42 = arith.constant 4.471500e-02 : f32
    %163 = vector.broadcast %cst_42 : f32 to vector<5x64xf32>
    %164 = arith.mulf %163, %160 : vector<5x64xf32>
    %165 = arith.mulf %164, %160 : vector<5x64xf32>
    %166 = arith.mulf %165, %160 : vector<5x64xf32>
    %167 = arith.addf %160, %166 : vector<5x64xf32>
    %cst_43 = arith.constant 0.797884583 : f32
    %168 = vector.broadcast %cst_43 : f32 to vector<5x64xf32>
    %169 = arith.mulf %168, %167 : vector<5x64xf32>
    %170 = math.tanh %169 : vector<5x64xf32>
    %cst_44 = arith.constant 1.000000e+00 : f32
    %171 = vector.broadcast %cst_44 : f32 to vector<5x64xf32>
    %172 = arith.addf %171, %170 : vector<5x64xf32>
    %173 = arith.mulf %162, %172 : vector<5x64xf32>
    %174 = arith.truncf %173 : vector<5x64xf32> to vector<5x64xbf16>
    %cst_45 = arith.constant dense<0.000000e+00> : vector<5x32xf32>
    %175 = tpu.matmul %174, %26, %cst_45 {dimension_numbers = #tpu.dot_dimension_numbers<[1], [0], [0], [1], [0, 0, 1, 1], [], []>} : vector<5x64xbf16>, vector<64x32xbf16>, vector<5x32xf32> -> vector<5x32xf32>
    %176 = arith.addf %134, %175 : vector<5x32xf32>
    %177 = vector.broadcast %20 : vector<1x32xf32> to vector<5x32xf32>
    %178 = arith.addf %176, %177 : vector<5x32xf32>
    %c1 = arith.constant 1 : index
    %c0_46 = arith.constant 0 : index
    %c0_47 = arith.constant 0 : index
    %179 = vector.load %arg3[%c1, %c0_46, %c0_47] : memref<2x8x128xf32, #tpu.memory_space<vmem>>, vector<1x8x128xf32>
    %180 = vector.shape_cast %179 : vector<1x8x128xf32> to vector<8x128xf32>
    %181 = vector.extract_strided_slice %180 {offsets = [0, 0], sizes = [1, 32], strides = [1, 1]} : vector<8x128xf32> to vector<1x32xf32>
    %182 = vector.extract_strided_slice %180 {offsets = [1, 0], sizes = [1, 32], strides = [1, 1]} : vector<8x128xf32> to vector<1x32xf32>
    %183 = vector.extract_strided_slice %180 {offsets = [2, 0], sizes = [1, 96], strides = [1, 1]} : vector<8x128xf32> to vector<1x96xf32>
    %184 = vector.extract_strided_slice %180 {offsets = [3, 0], sizes = [1, 32], strides = [1, 1]} : vector<8x128xf32> to vector<1x32xf32>
    %185 = vector.extract_strided_slice %180 {offsets = [4, 0], sizes = [1, 32], strides = [1, 1]} : vector<8x128xf32> to vector<1x32xf32>
    %186 = vector.extract_strided_slice %180 {offsets = [5, 0], sizes = [1, 32], strides = [1, 1]} : vector<8x128xf32> to vector<1x32xf32>
    %187 = vector.extract_strided_slice %180 {offsets = [6, 0], sizes = [1, 64], strides = [1, 1]} : vector<8x128xf32> to vector<1x64xf32>
    %188 = vector.extract_strided_slice %180 {offsets = [7, 0], sizes = [1, 32], strides = [1, 1]} : vector<8x128xf32> to vector<1x32xf32>
    %c1_48 = arith.constant 1 : index
    %c0_49 = arith.constant 0 : index
    %c0_50 = arith.constant 0 : index
    %189 = vector.load %arg5[%c1_48, %c0_49, %c0_50] : memref<2x64x512xbf16, #tpu.memory_space<vmem>>, vector<1x64x512xbf16>
    %190 = vector.shape_cast %189 : vector<1x64x512xbf16> to vector<64x512xbf16>
    %191 = vector.extract_strided_slice %190 {offsets = [0, 0], sizes = [32, 96], strides = [1, 1]} : vector<64x512xbf16> to vector<32x96xbf16>
    %192 = vector.extract_strided_slice %190 {offsets = [0, 128], sizes = [32, 64], strides = [1, 1]} : vector<64x512xbf16> to vector<32x64xbf16>
    %193 = vector.extract_strided_slice %190 {offsets = [0, 256], sizes = [32, 32], strides = [1, 1]} : vector<64x512xbf16> to vector<32x32xbf16>
    %194 = vector.extract_strided_slice %190 {offsets = [0, 384], sizes = [64, 32], strides = [1, 1]} : vector<64x512xbf16> to vector<64x32xbf16>
    %cst_51 = arith.constant dense<0.000000e+00> : vector<5xf32>
    %195 = vector.multi_reduction <add>, %178, %cst_51 [1] : vector<5x32xf32> to vector<5xf32>
    %196 = vector.shape_cast %195 : vector<5xf32> to vector<5x1xf32>
    %cst_52 = arith.constant 3.200000e+01 : f32
    %197 = vector.broadcast %cst_52 : f32 to vector<5x1xf32>
    %198 = arith.divf %196, %197 : vector<5x1xf32>
    %199 = vector.broadcast %198 : vector<5x1xf32> to vector<5x32xf32>
    %200 = arith.subf %178, %199 : vector<5x32xf32>
    %201 = arith.mulf %200, %200 : vector<5x32xf32>
    %cst_53 = arith.constant dense<0.000000e+00> : vector<5xf32>
    %202 = vector.multi_reduction <add>, %201, %cst_53 [1] : vector<5x32xf32> to vector<5xf32>
    %203 = vector.shape_cast %202 : vector<5xf32> to vector<5x1xf32>
    %cst_54 = arith.constant 3.200000e+01 : f32
    %204 = vector.broadcast %cst_54 : f32 to vector<5x1xf32>
    %205 = arith.divf %203, %204 : vector<5x1xf32>
    %206 = vector.broadcast %198 : vector<5x1xf32> to vector<5x32xf32>
    %207 = arith.subf %178, %206 : vector<5x32xf32>
    %cst_55 = arith.constant 9.99999996E-13 : f32
    %208 = vector.broadcast %cst_55 : f32 to vector<5x1xf32>
    %209 = arith.addf %205, %208 : vector<5x1xf32>
    %210 = math.rsqrt %209 : vector<5x1xf32>
    %211 = vector.broadcast %210 : vector<5x1xf32> to vector<5x32xf32>
    %212 = arith.mulf %207, %211 : vector<5x32xf32>
    %213 = vector.broadcast %181 : vector<1x32xf32> to vector<5x32xf32>
    %214 = arith.mulf %212, %213 : vector<5x32xf32>
    %215 = vector.broadcast %182 : vector<1x32xf32> to vector<5x32xf32>
    %216 = arith.addf %214, %215 : vector<5x32xf32>
    %217 = arith.truncf %216 : vector<5x32xf32> to vector<5x32xbf16>
    %cst_56 = arith.constant dense<0.000000e+00> : vector<5x96xf32>
    %218 = tpu.matmul %217, %191, %cst_56 {dimension_numbers = #tpu.dot_dimension_numbers<[1], [0], [0], [1], [0, 0, 1, 1], [], []>} : vector<5x32xbf16>, vector<32x96xbf16>, vector<5x96xf32> -> vector<5x96xf32>
    %219 = vector.broadcast %183 : vector<1x96xf32> to vector<5x96xf32>
    %220 = arith.addf %218, %219 : vector<5x96xf32>
    %221 = vector.extract_strided_slice %220 {offsets = [0, 0], sizes = [5, 8], strides = [1, 1]} : vector<5x96xf32> to vector<5x8xf32>
    %222 = vector.extract_strided_slice %220 {offsets = [0, 32], sizes = [5, 8], strides = [1, 1]} : vector<5x96xf32> to vector<5x8xf32>
    %223 = vector.extract_strided_slice %220 {offsets = [0, 64], sizes = [5, 8], strides = [1, 1]} : vector<5x96xf32> to vector<5x8xf32>
    %224 = arith.truncf %221 : vector<5x8xf32> to vector<5x8xbf16>
    %225 = arith.truncf %222 : vector<5x8xf32> to vector<5x8xbf16>
    %cst_57 = arith.constant dense<0.000000e+00> : vector<5x5xf32>
    %226 = tpu.matmul %224, %225, %cst_57 {dimension_numbers = #tpu.dot_dimension_numbers<[1], [1], [0], [0], [0, 0, 1, 0], [], []>} : vector<5x8xbf16>, vector<5x8xbf16>, vector<5x5xf32> -> vector<5x5xf32>
    %cst_58 = arith.constant dense<0xFF800000> : vector<5xf32>
    %227 = vector.multi_reduction <maximumf>, %226, %cst_58 [1] : vector<5x5xf32> to vector<5xf32>
    %228 = vector.shape_cast %227 : vector<5xf32> to vector<5x1xf32>
    %229 = vector.broadcast %228 : vector<5x1xf32> to vector<5x5xf32>
    %230 = arith.subf %226, %229 : vector<5x5xf32>
    %231 = math.exp %230 : vector<5x5xf32>
    %cst_59 = arith.constant dense<0.000000e+00> : vector<5xf32>
    %232 = vector.multi_reduction <add>, %231, %cst_59 [1] : vector<5x5xf32> to vector<5xf32>
    %233 = vector.shape_cast %232 : vector<5xf32> to vector<5x1xf32>
    %234 = tpu.reciprocal %233 {approx = true} : vector<5x1xf32> -> vector<5x1xf32>
    %235 = vector.broadcast %234 : vector<5x1xf32> to vector<5x5xf32>
    %236 = arith.mulf %231, %235 : vector<5x5xf32>
    %237 = arith.truncf %236 : vector<5x5xf32> to vector<5x5xbf16>
    %238 = arith.truncf %223 : vector<5x8xf32> to vector<5x8xbf16>
    %cst_60 = arith.constant dense<0.000000e+00> : vector<5x8xf32>
    %239 = tpu.matmul %237, %238, %cst_60 {dimension_numbers = #tpu.dot_dimension_numbers<[1], [0], [0], [1], [0, 0, 1, 1], [], []>} : vector<5x5xbf16>, vector<5x8xbf16>, vector<5x8xf32> -> vector<5x8xf32>
    %240 = vector.extract_strided_slice %220 {offsets = [0, 8], sizes = [5, 8], strides = [1, 1]} : vector<5x96xf32> to vector<5x8xf32>
    %241 = vector.extract_strided_slice %220 {offsets = [0, 40], sizes = [5, 8], strides = [1, 1]} : vector<5x96xf32> to vector<5x8xf32>
    %242 = vector.extract_strided_slice %220 {offsets = [0, 72], sizes = [5, 8], strides = [1, 1]} : vector<5x96xf32> to vector<5x8xf32>
    %243 = arith.truncf %240 : vector<5x8xf32> to vector<5x8xbf16>
    %244 = arith.truncf %241 : vector<5x8xf32> to vector<5x8xbf16>
    %cst_61 = arith.constant dense<0.000000e+00> : vector<5x5xf32>
    %245 = tpu.matmul %243, %244, %cst_61 {dimension_numbers = #tpu.dot_dimension_numbers<[1], [1], [0], [0], [0, 0, 1, 0], [], []>} : vector<5x8xbf16>, vector<5x8xbf16>, vector<5x5xf32> -> vector<5x5xf32>
    %cst_62 = arith.constant dense<0xFF800000> : vector<5xf32>
    %246 = vector.multi_reduction <maximumf>, %245, %cst_62 [1] : vector<5x5xf32> to vector<5xf32>
    %247 = vector.shape_cast %246 : vector<5xf32> to vector<5x1xf32>
    %248 = vector.broadcast %247 : vector<5x1xf32> to vector<5x5xf32>
    %249 = arith.subf %245, %248 : vector<5x5xf32>
    %250 = math.exp %249 : vector<5x5xf32>
    %cst_63 = arith.constant dense<0.000000e+00> : vector<5xf32>
    %251 = vector.multi_reduction <add>, %250, %cst_63 [1] : vector<5x5xf32> to vector<5xf32>
    %252 = vector.shape_cast %251 : vector<5xf32> to vector<5x1xf32>
    %253 = tpu.reciprocal %252 {approx = true} : vector<5x1xf32> -> vector<5x1xf32>
    %254 = vector.broadcast %253 : vector<5x1xf32> to vector<5x5xf32>
    %255 = arith.mulf %250, %254 : vector<5x5xf32>
    %256 = arith.truncf %255 : vector<5x5xf32> to vector<5x5xbf16>
    %257 = arith.truncf %242 : vector<5x8xf32> to vector<5x8xbf16>
    %cst_64 = arith.constant dense<0.000000e+00> : vector<5x8xf32>
    %258 = tpu.matmul %256, %257, %cst_64 {dimension_numbers = #tpu.dot_dimension_numbers<[1], [0], [0], [1], [0, 0, 1, 1], [], []>} : vector<5x5xbf16>, vector<5x8xbf16>, vector<5x8xf32> -> vector<5x8xf32>
    %259 = vector.extract_strided_slice %220 {offsets = [0, 16], sizes = [5, 8], strides = [1, 1]} : vector<5x96xf32> to vector<5x8xf32>
    %260 = vector.extract_strided_slice %220 {offsets = [0, 48], sizes = [5, 8], strides = [1, 1]} : vector<5x96xf32> to vector<5x8xf32>
    %261 = vector.extract_strided_slice %220 {offsets = [0, 80], sizes = [5, 8], strides = [1, 1]} : vector<5x96xf32> to vector<5x8xf32>
    %262 = arith.truncf %259 : vector<5x8xf32> to vector<5x8xbf16>
    %263 = arith.truncf %260 : vector<5x8xf32> to vector<5x8xbf16>
    %cst_65 = arith.constant dense<0.000000e+00> : vector<5x5xf32>
    %264 = tpu.matmul %262, %263, %cst_65 {dimension_numbers = #tpu.dot_dimension_numbers<[1], [1], [0], [0], [0, 0, 1, 0], [], []>} : vector<5x8xbf16>, vector<5x8xbf16>, vector<5x5xf32> -> vector<5x5xf32>
    %cst_66 = arith.constant dense<0xFF800000> : vector<5xf32>
    %265 = vector.multi_reduction <maximumf>, %264, %cst_66 [1] : vector<5x5xf32> to vector<5xf32>
    %266 = vector.shape_cast %265 : vector<5xf32> to vector<5x1xf32>
    %267 = vector.broadcast %266 : vector<5x1xf32> to vector<5x5xf32>
    %268 = arith.subf %264, %267 : vector<5x5xf32>
    %269 = math.exp %268 : vector<5x5xf32>
    %cst_67 = arith.constant dense<0.000000e+00> : vector<5xf32>
    %270 = vector.multi_reduction <add>, %269, %cst_67 [1] : vector<5x5xf32> to vector<5xf32>
    %271 = vector.shape_cast %270 : vector<5xf32> to vector<5x1xf32>
    %272 = tpu.reciprocal %271 {approx = true} : vector<5x1xf32> -> vector<5x1xf32>
    %273 = vector.broadcast %272 : vector<5x1xf32> to vector<5x5xf32>
    %274 = arith.mulf %269, %273 : vector<5x5xf32>
    %275 = arith.truncf %274 : vector<5x5xf32> to vector<5x5xbf16>
    %276 = arith.truncf %261 : vector<5x8xf32> to vector<5x8xbf16>
    %cst_68 = arith.constant dense<0.000000e+00> : vector<5x8xf32>
    %277 = tpu.matmul %275, %276, %cst_68 {dimension_numbers = #tpu.dot_dimension_numbers<[1], [0], [0], [1], [0, 0, 1, 1], [], []>} : vector<5x5xbf16>, vector<5x8xbf16>, vector<5x8xf32> -> vector<5x8xf32>
    %278 = vector.extract_strided_slice %220 {offsets = [0, 24], sizes = [5, 8], strides = [1, 1]} : vector<5x96xf32> to vector<5x8xf32>
    %279 = vector.extract_strided_slice %220 {offsets = [0, 56], sizes = [5, 8], strides = [1, 1]} : vector<5x96xf32> to vector<5x8xf32>
    %280 = vector.extract_strided_slice %220 {offsets = [0, 88], sizes = [5, 8], strides = [1, 1]} : vector<5x96xf32> to vector<5x8xf32>
    %281 = arith.truncf %278 : vector<5x8xf32> to vector<5x8xbf16>
    %282 = arith.truncf %279 : vector<5x8xf32> to vector<5x8xbf16>
    %cst_69 = arith.constant dense<0.000000e+00> : vector<5x5xf32>
    %283 = tpu.matmul %281, %282, %cst_69 {dimension_numbers = #tpu.dot_dimension_numbers<[1], [1], [0], [0], [0, 0, 1, 0], [], []>} : vector<5x8xbf16>, vector<5x8xbf16>, vector<5x5xf32> -> vector<5x5xf32>
    %cst_70 = arith.constant dense<0xFF800000> : vector<5xf32>
    %284 = vector.multi_reduction <maximumf>, %283, %cst_70 [1] : vector<5x5xf32> to vector<5xf32>
    %285 = vector.shape_cast %284 : vector<5xf32> to vector<5x1xf32>
    %286 = vector.broadcast %285 : vector<5x1xf32> to vector<5x5xf32>
    %287 = arith.subf %283, %286 : vector<5x5xf32>
    %288 = math.exp %287 : vector<5x5xf32>
    %cst_71 = arith.constant dense<0.000000e+00> : vector<5xf32>
    %289 = vector.multi_reduction <add>, %288, %cst_71 [1] : vector<5x5xf32> to vector<5xf32>
    %290 = vector.shape_cast %289 : vector<5xf32> to vector<5x1xf32>
    %291 = tpu.reciprocal %290 {approx = true} : vector<5x1xf32> -> vector<5x1xf32>
    %292 = vector.broadcast %291 : vector<5x1xf32> to vector<5x5xf32>
    %293 = arith.mulf %288, %292 : vector<5x5xf32>
    %294 = arith.truncf %293 : vector<5x5xf32> to vector<5x5xbf16>
    %295 = arith.truncf %280 : vector<5x8xf32> to vector<5x8xbf16>
    %cst_72 = arith.constant dense<0.000000e+00> : vector<5x8xf32>
    %296 = tpu.matmul %294, %295, %cst_72 {dimension_numbers = #tpu.dot_dimension_numbers<[1], [0], [0], [1], [0, 0, 1, 1], [], []>} : vector<5x5xbf16>, vector<5x8xbf16>, vector<5x8xf32> -> vector<5x8xf32>
    %297 = tpu.concatenate %239, %258, %277, %296 in 1 : vector<5x8xf32>, vector<5x8xf32>, vector<5x8xf32>, vector<5x8xf32> -> vector<5x32xf32>
    %298 = arith.truncf %297 : vector<5x32xf32> to vector<5x32xbf16>
    %cst_73 = arith.constant dense<0.000000e+00> : vector<5x32xf32>
    %299 = tpu.matmul %298, %193, %cst_73 {dimension_numbers = #tpu.dot_dimension_numbers<[1], [0], [0], [1], [0, 0, 1, 1], [], []>} : vector<5x32xbf16>, vector<32x32xbf16>, vector<5x32xf32> -> vector<5x32xf32>
    %300 = arith.addf %178, %299 : vector<5x32xf32>
    %301 = vector.broadcast %184 : vector<1x32xf32> to vector<5x32xf32>
    %302 = arith.addf %300, %301 : vector<5x32xf32>
    %cst_74 = arith.constant dense<0.000000e+00> : vector<5xf32>
    %303 = vector.multi_reduction <add>, %302, %cst_74 [1] : vector<5x32xf32> to vector<5xf32>
    %304 = vector.shape_cast %303 : vector<5xf32> to vector<5x1xf32>
    %cst_75 = arith.constant 3.200000e+01 : f32
    %305 = vector.broadcast %cst_75 : f32 to vector<5x1xf32>
    %306 = arith.divf %304, %305 : vector<5x1xf32>
    %307 = vector.broadcast %306 : vector<5x1xf32> to vector<5x32xf32>
    %308 = arith.subf %302, %307 : vector<5x32xf32>
    %309 = arith.mulf %308, %308 : vector<5x32xf32>
    %cst_76 = arith.constant dense<0.000000e+00> : vector<5xf32>
    %310 = vector.multi_reduction <add>, %309, %cst_76 [1] : vector<5x32xf32> to vector<5xf32>
    %311 = vector.shape_cast %310 : vector<5xf32> to vector<5x1xf32>
    %cst_77 = arith.constant 3.200000e+01 : f32
    %312 = vector.broadcast %cst_77 : f32 to vector<5x1xf32>
    %313 = arith.divf %311, %312 : vector<5x1xf32>
    %314 = vector.broadcast %306 : vector<5x1xf32> to vector<5x32xf32>
    %315 = arith.subf %302, %314 : vector<5x32xf32>
    %cst_78 = arith.constant 9.99999996E-13 : f32
    %316 = vector.broadcast %cst_78 : f32 to vector<5x1xf32>
    %317 = arith.addf %313, %316 : vector<5x1xf32>
    %318 = math.rsqrt %317 : vector<5x1xf32>
    %319 = vector.broadcast %318 : vector<5x1xf32> to vector<5x32xf32>
    %320 = arith.mulf %315, %319 : vector<5x32xf32>
    %321 = vector.broadcast %185 : vector<1x32xf32> to vector<5x32xf32>
    %322 = arith.mulf %320, %321 : vector<5x32xf32>
    %323 = vector.broadcast %186 : vector<1x32xf32> to vector<5x32xf32>
    %324 = arith.addf %322, %323 : vector<5x32xf32>
    %325 = arith.truncf %324 : vector<5x32xf32> to vector<5x32xbf16>
    %cst_79 = arith.constant dense<0.000000e+00> : vector<5x64xf32>
    %326 = tpu.matmul %325, %192, %cst_79 {dimension_numbers = #tpu.dot_dimension_numbers<[1], [0], [0], [1], [0, 0, 1, 1], [], []>} : vector<5x32xbf16>, vector<32x64xbf16>, vector<5x64xf32> -> vector<5x64xf32>
    %327 = vector.broadcast %187 : vector<1x64xf32> to vector<5x64xf32>
    %328 = arith.addf %326, %327 : vector<5x64xf32>
    %cst_80 = arith.constant 5.000000e-01 : f32
    %329 = vector.broadcast %cst_80 : f32 to vector<5x64xf32>
    %330 = arith.mulf %329, %328 : vector<5x64xf32>
    %cst_81 = arith.constant 4.471500e-02 : f32
    %331 = vector.broadcast %cst_81 : f32 to vector<5x64xf32>
    %332 = arith.mulf %331, %328 : vector<5x64xf32>
    %333 = arith.mulf %332, %328 : vector<5x64xf32>
    %334 = arith.mulf %333, %328 : vector<5x64xf32>
    %335 = arith.addf %328, %334 : vector<5x64xf32>
    %cst_82 = arith.constant 0.797884583 : f32
    %336 = vector.broadcast %cst_82 : f32 to vector<5x64xf32>
    %337 = arith.mulf %336, %335 : vector<5x64xf32>
    %338 = math.tanh %337 : vector<5x64xf32>
    %cst_83 = arith.constant 1.000000e+00 : f32
    %339 = vector.broadcast %cst_83 : f32 to vector<5x64xf32>
    %340 = arith.addf %339, %338 : vector<5x64xf32>
    %341 = arith.mulf %330, %340 : vector<5x64xf32>
    %342 = arith.truncf %341 : vector<5x64xf32> to vector<5x64xbf16>
    %cst_84 = arith.constant dense<0.000000e+00> : vector<5x32xf32>
    %343 = tpu.matmul %342, %194, %cst_84 {dimension_numbers = #tpu.dot_dimension_numbers<[1], [0], [0], [1], [0, 0, 1, 1], [], []>} : vector<5x64xbf16>, vector<64x32xbf16>, vector<5x32xf32> -> vector<5x32xf32>
    %344 = arith.addf %302, %343 : vector<5x32xf32>
    %345 = vector.broadcast %188 : vector<1x32xf32> to vector<5x32xf32>
    %346 = arith.addf %344, %345 : vector<5x32xf32>
    %347 = vector.extract_strided_slice %346 {offsets = [0, 0], sizes = [1, 32], strides = [1, 1]} : vector<5x32xf32> to vector<1x32xf32>
    %cst_85 = arith.constant dense<0.000000e+00> : vector<1xf32>
    %348 = vector.multi_reduction <add>, %347, %cst_85 [1] : vector<1x32xf32> to vector<1xf32>
    %349 = vector.shape_cast %348 : vector<1xf32> to vector<1x1xf32>
    %cst_86 = arith.constant 3.200000e+01 : f32
    %350 = vector.broadcast %cst_86 : f32 to vector<1x1xf32>
    %351 = arith.divf %349, %350 : vector<1x1xf32>
    %352 = vector.broadcast %351 : vector<1x1xf32> to vector<1x32xf32>
    %353 = arith.subf %347, %352 : vector<1x32xf32>
    %354 = arith.mulf %353, %353 : vector<1x32xf32>
    %cst_87 = arith.constant dense<0.000000e+00> : vector<1xf32>
    %355 = vector.multi_reduction <add>, %354, %cst_87 [1] : vector<1x32xf32> to vector<1xf32>
    %356 = vector.shape_cast %355 : vector<1xf32> to vector<1x1xf32>
    %cst_88 = arith.constant 3.200000e+01 : f32
    %357 = vector.broadcast %cst_88 : f32 to vector<1x1xf32>
    %358 = arith.divf %356, %357 : vector<1x1xf32>
    %359 = vector.broadcast %351 : vector<1x1xf32> to vector<1x32xf32>
    %360 = arith.subf %347, %359 : vector<1x32xf32>
    %cst_89 = arith.constant 9.99999996E-13 : f32
    %361 = vector.broadcast %cst_89 : f32 to vector<1x1xf32>
    %362 = arith.addf %358, %361 : vector<1x1xf32>
    %363 = math.rsqrt %362 : vector<1x1xf32>
    %364 = vector.broadcast %363 : vector<1x1xf32> to vector<1x32xf32>
    %365 = arith.mulf %360, %364 : vector<1x32xf32>
    %366 = arith.mulf %365, %2 : vector<1x32xf32>
    %367 = arith.addf %366, %3 : vector<1x32xf32>
    %368 = arith.truncf %367 : vector<1x32xf32> to vector<1x32xbf16>
    %c0_90 = arith.constant 0 : index
    %c0_91 = arith.constant 0 : index
    %369 = vector.load %arg6[%c0_90, %c0_91] : memref<32x128xbf16, #tpu.memory_space<vmem>>, vector<32x128xbf16>
    %cst_92 = arith.constant dense<0.000000e+00> : vector<1x128xf32>
    %370 = tpu.matmul %368, %369, %cst_92 {dimension_numbers = #tpu.dot_dimension_numbers<[1], [0], [0], [1], [0, 0, 1, 1], [], []>} : vector<1x32xbf16>, vector<32x128xbf16>, vector<1x128xf32> -> vector<1x128xf32>
    %371 = arith.addf %370, %4 : vector<1x128xf32>
    %372 = vector.shape_cast %371 : vector<1x128xf32> to vector<1x128xf32>
    %373 = vector.broadcast %372 : vector<1x128xf32> to vector<8x128xf32>
    %c0_93 = arith.constant 0 : index
    %c0_94 = arith.constant 0 : index
    %c0_95 = arith.constant 0 : index
    %374 = vector.load %arg7[%c0_93, %c0_94, %c0_95] : memref<1x8x128xf32, #tpu.memory_space<vmem>>, vector<1x8x128xf32>
    %375 = vector.shape_cast %374 : vector<1x8x128xf32> to vector<8x128xf32>
    %376 = vector.shape_cast %373 : vector<8x128xf32> to vector<1x8x128xf32>
    tpu.vector_store %arg7[%c0_93, %c0_94, %c0_95], %376 {strides = array<i32>} : memref<1x8x128xf32, #tpu.memory_space<vmem>>, vector<1x8x128xf32>,
    return
  }
  func.func @transform_0(%arg0: i32) -> (i32, i32, i32) {
    %c0_i32 = arith.constant 0 : i32
    %c0_i32_0 = arith.constant 0 : i32
    %c0_i32_1 = arith.constant 0 : i32
    return %arg0, %c0_i32, %c0_i32_0 : i32, i32, i32
  }
  func.func @transform_1(%arg0: i32) -> (i32, i32) {
    %c0_i32 = arith.constant 0 : i32
    %c0_i32_0 = arith.constant 0 : i32
    %c0_i32_1 = arith.constant 0 : i32
    return %c0_i32, %c0_i32_0 : i32, i32
  }
  func.func @transform_2(%arg0: i32) -> (i32, i32, i32) {
    %c0_i32 = arith.constant 0 : i32
    %c0_i32_0 = arith.constant 0 : i32
    %c0_i32_1 = arith.constant 0 : i32
    %c0_i32_2 = arith.constant 0 : i32
    return %c0_i32, %c0_i32_0, %c0_i32_1 : i32, i32, i32
  }
  func.func @transform_3(%arg0: i32) -> (i32, i32) {
    %c0_i32 = arith.constant 0 : i32
    %c0_i32_0 = arith.constant 0 : i32
    %c0_i32_1 = arith.constant 0 : i32
    return %c0_i32, %c0_i32_0 : i32, i32
  }
  func.func @transform_4(%arg0: i32) -> (i32, i32, i32) {
    %c0_i32 = arith.constant 0 : i32
    %c0_i32_0 = arith.constant 0 : i32
    %c0_i32_1 = arith.constant 0 : i32
    %c0_i32_2 = arith.constant 0 : i32
    return %c0_i32, %c0_i32_0, %c0_i32_1 : i32, i32, i32
  }
  func.func @transform_5(%arg0: i32) -> (i32, i32) {
    %c0_i32 = arith.constant 0 : i32
    %c0_i32_0 = arith.constant 0 : i32
    %c0_i32_1 = arith.constant 0 : i32
    return %c0_i32, %c0_i32_0 : i32, i32
  }
  func.func @transform_6(%arg0: i32) -> (i32, i32, i32) {
    %c0_i32 = arith.constant 0 : i32
    %c0_i32_0 = arith.constant 0 : i32
    %c0_i32_1 = arith.constant 0 : i32
    return %arg0, %c0_i32, %c0_i32_0 : i32, i32, i32
  }
}

</mosaic_0001>

<bundles_post_ra>
// kernel: vit_forward.1
= control target key start
LH: loop header
LB: loop body
LE: loop exit
PB: predicated region body
PF: predicated region fallthrough
CT: control target
= control target key end

     0   :  { %s1756_s21 = smov 0   ;;  %s2136_s0 = inlined_call_operand.vmem [shape: f32[2,5,192], index: 0, kind: input, shape index: {}]   ;;  %s2137_s1 = inlined_call_operand.vmem [shape: f32[8,128], index: 1, kind: input, shape index: {}]   ;;  %s2138_s2 = inlined_call_operand.vmem [shape: f32[2,8,128], index: 2, kind: input, shape index: {}]   ;;  %s2139_s3 = inlined_call_operand.vmem [shape: bf16[192,32], index: 3, kind: input, shape index: {}]   ;;  %s2140_s4 = inlined_call_operand.vmem [shape: bf16[2,64,512], index: 4, kind: input, shape index: {}]   ;;  %s2141_s5 = inlined_call_operand.vmem [shape: bf16[32,128], index: 5, kind: input, shape index: {}]   ;;  %s2142_s6 = inlined_call_operand.vmem [shape: f32[2,8,128], index: 6, kind: output, shape index: {}]  }
   0x1 LB: > { %s1404_s22 = sadd.s32 4294967295, %s1703_s21   ;;  %p1408_p0 = scmp.ge.s32.totalorder %s1703_s21, 1  ;;  %s1703_s21 = sphi %s1756_s21, %s16_s21  }
   0x2   : > { %p212_p1 = scmp.lt.s32.totalorder %s1703_s21, 3 }
   0x4   : > { %p213_p2 = pnand %p1408_p0, %p212_p1 }
   0x5   : > { %p241_p3 = scmp.lt.s32.totalorder (!%p213_p2), %s1404_s22, 1  ;;  %s1706_s17 = smov (!%p213_p2), 88  }
   0x6   : > { %216 = sbr.rel (%p213_p2) target bundleno = 4733 (0x127d), region = 44  ;;  %s1707_s18 = smov (!%p213_p2), 64  }
   0x7   : > { %s1708_s19 = smov (!%p213_p2), 96   ;;  %s1709_s20 = smov (!%p213_p2), 80  }
   0x8   : > { %s1710_s23 = smov (!%p213_p2), 120   ;;  %s1711_s24 = smov (!%p213_p2), 72  }
   0x9   : > { %s1712_s25 = smov (!%p213_p2), 112   ;;  %s1714_s26 = smov (!%p213_p2), 104  }
   0xa   : > { %s1715_s27 = smov (!%p213_p2), 56   ;;  %s1716_s28 = smov (!%p213_p2), 48  }
   0xb   : > { %v1597_v0 = vld [vmem:[%s2139_s3 + $0x38] sm:$0xff]  ;;  %v1596_v2 = vld [vmem:[%s2139_s3 + $0x30] sm:$0xff]  ;;  %s2148_s22 = smov (!%p241_p3, %s1404_s22), 1  ;;  %v1595_v4 = vld [vmem:[%s2139_s3 + $0x28] sm:$0xff]  ;;  %vm352_vm0 = vcmask 523264   ;;  %vm395_vm1 = vcmask 258048  }
   0xc   : > { %v1601_v1 = vld [vmem:[%s2139_s3 + $0x58] sm:$0xff]  ;;  %356 = vmatpush.bf16.msra.mxu0 %v1597_v0  ;;  %v1600_v3 = vld [vmem:[%s2139_s3 + $0x50] sm:$0xff]  ;;  %s1589_s7 = sshll.u32 %s2148_s22, 4  ;;  %v1599_v5 = vld [vmem:[%s2139_s3 + $0x48] sm:$0xff]  ;;  %v1705_v24 = vmov 32.0   ;;  %vm443_vm6 = vcmask 261120  }
   0xd   : > { %373 = vmatpush.bf16.msra.mxu1 %v1601_v1  ;;  %s245_s14 = scalar_lea.vmem %s2136_s0, %s1589_s7  ;;  %v1594_v6 = vld [vmem:[%s2139_s3 + $0x20] sm:$0xff]  ;;  %v1593_v9 = vld [vmem:[%s2139_s3 + $0x18] sm:$0xff]  ;;  %v1592_v11 = vld [vmem:[%s2139_s3 + $0x10] sm:$0xff]  ;;  %1648 = vrcp.f32 %v1705_v24  ;;  %vm503_vm7 = vcmask 1041408   ;;  %vm504_vm8 = vcmask 1042432   ;;  %v1713_v0 = vmov 65535  }
   0xe   : > { %v1598_v7 = vld [vmem:[%s2139_s3 + $0x40] sm:$0xff]  ;;  %v253_v8 = vld [vmem:[%s245_s14 + $0x8] sm:$0x1f]  ;;  %v1608_v37 = vld [vmem:[%s2140_s4 + $0x2c] sm:$0xf0]  ;;  %v505_v1 = vsel %vm503_vm7, 4294967295, %v1713_v0 }
   0xf   : > { %v255_v10 = vpack.c.bf16 %v253_v8, %v253_v8  ;;  %v1591_v12 = vld [vmem:[%s2139_s3 + $0x8] sm:$0xff]  ;;  %v1590_v13 = vld [vmem:[%s2139_s3] sm:$0xff]  ;;  %v1604_v40 = vld [vmem:[%s2140_s4 + $0xc] sm:$0xf0]  ;;  %vm464_vm9 = vcmask 64512   ;;  %vm484_vm10 = vcmask 36864  }
  0x10   : > { %357 = vmatpush.bf16.msra.mxu0 %v1596_v2  ;;  %v252_v14 = vld [vmem:[%s245_s14] sm:$0x1f]  ;;  %v1857_v2 = vsel %vm504_vm8, %v505_v1, 0  ;;  %vm499_vm11 = vcmask 39936   ;;  %s1717_s29 = smov 8   ;;  %s1718_s30 = smov 40  }
  0x11   : > { %374 = vmatpush.bf16.msra.mxu1 %v1600_v3  ;;  %v254_v15 = vpack.c.bf16 %v252_v14, %v252_v14  ;;  %v251_v18 = vld [vmem:[%s2137_s1] sm:$0xff]  ;;  %s2144_s7 = smov 24   ;;  %s2143_s8 = smov 16   ;;  %vm704_vm12 = vcmask 130048   ;;  %vm706_vm13 = vcmask 195584  }
  0x12   : > { %v1467_v36 = vld [vmem:[%s2140_s4 + $0x20] sm:$0xf]  ;;  %s1411_s11 = sshll.u32 %s2148_s22, 3 }
  0x13   : > { %v1649_v25 = vpop.eup %1648  ;;  %v1468_v38 = vor.u32 %v1608_v37, %v1467_v36  ;;  %v1463_v39 = vld [vmem:[%s2140_s4] sm:$0xf]  ;;  %s249_s14 = scalar_lea.vmem %s2142_s6, %s1411_s11 }
  0x14   : > { %358 = vmatpush.bf16.msra.mxu0 %v1595_v4  ;;  %v400_v26 = vmul.f32 32.0, %v1649_v25  ;;  %vm404_vm2 = vweird.f32 %v1649_v25  ;;  %v1464_v41 = vor.u32 %v1604_v40, %v1463_v39  ;;  %v1835_v50 = vld [vmem:[%s2138_s2] sm:$0xff] }
  0x15   : > { %375 = vmatpush.bf16.msra.mxu1 %v1599_v5  ;;  %453 = vmatpush.bf16.msra.mxu2 %v1468_v38  ;;  %v425_v52 = vperm.slane %v1835_v50, 0  ;;  %v427_v55 = vperm.slane %v1835_v50, 1  ;;  %v430_v59 = vperm.slane %v1835_v50, 2 }
  0x16   : > { %v401_v27 = vsub.f32 1.0, %v400_v26 }
  0x18   : > { %359 = vmatpush.bf16.msra.mxu0 %v1594_v6  ;;  %v402_v28 = vmul.f32 %v1649_v25, %v401_v27 }
  0x19   : > { %376 = vmatpush.bf16.msra.mxu1 %v1598_v7  ;;  %454 = vmatpush.bf16.msra.mxu2 %v1464_v41 }
  0x1a   : > { %v403_v29 = vadd.f32 %v1649_v25, %v402_v28 }
  0x1c   : > { %360 = vmatpush.bf16.msra.mxu0 %v1593_v9  ;;  %1460 = vmatmul.msk.bf16.vlgmr.msra.gmra.mxu1 %vm352_vm0, %v255_v10  ;;  %v1814_v30 = vsel %vm404_vm2, %v1649_v25, %v403_v29 }
  0x20   : > { %361 = vmatpush.bf16.msra.mxu0 %v1592_v11 }
  0x24   : > { %362 = vmatpush.bf16.msra.mxu0 %v1591_v12 }
  0x28   : > { %363 = vmatpush.bf16.msra.mxu0 %v1590_v13 }
  0x2b   : > { %364 = vmatmul.bf16.vlgmr.msra.gmra.mxu0 %v254_v15 }
  0x99   : > { %v378_v16 = vpop.f32.mrf.mxu1 }
  0xa1   : > { %v380_v17 = vpop.f32.mrf.mxu1 }
  0xa8   : > { %v365_v19 = vpop.f32.mrf.mxu0 }
  0xa9   : > { %v366_v20 = vadd.f32 %v365_v19, %v251_v18 }
  0xab   : > { %v1810_v21 = vadd.f32 %v378_v16, %v366_v20 }
  0xad   : > { %v396_v22 = vsel %vm395_vm1, %v1810_v21, 0.0 }
  0xae   : > { %397 = vadd.xlane.f32.xlu0 %v396_v22 }
  0xb0   : > { %v367_v23 = vpop.f32.mrf.mxu0 }
 0x121   : > { %v398_v31 = vpop.xlane.xlu0 %397 }
 0x122   : > { %v406_v32 = vmul.f32 %v1814_v30, %v398_v31 }
 0x124   : > { %v407_v33 = vsub.f32 %v1810_v21, %v406_v32 }
 0x126   : > { %v408_v34 = vmul.f32 %v407_v33, %v407_v33 }
 0x128   : > { %v409_v35 = vsel %vm395_vm1, %v408_v34, 0.0 }
 0x129   : > { %410 = vadd.xlane.f32.xlu0 %v409_v35 }
 0x19c   : > { %v411_v42 = vpop.xlane.xlu0 %410 }
 0x19d   : > { %v412_v43 = vmul.f32 %v411_v42, %v1814_v30 }
 0x19f   : > { %v413_v44 = vadd.f32 1e-12, %v412_v43 }
 0x1a1   : > { %1650 = vrsqrt.f32 %v413_v44  ;;  %vm420_vm4 = vweird.f32 %v413_v44 }
 0x1a7   : > { %v1651_v45 = vpop.eup %1650 }
 0x1a8   : > { %v415_v46 = vmul.f32 %v1651_v45, %v413_v44  ;;  %vm421_vm3 = vweird.f32 %v1651_v45 }
 0x1a9   : > { %vm422_vm5 = vmor %vm420_vm4, %vm421_vm3 }
 0x1aa   : > { %v416_v47 = vmul.f32 %v1651_v45, %v415_v46 }
 0x1ac   : > { %v417_v48 = vmul.f32 0.5, %v416_v47 }
 0x1ae   : > { %v418_v49 = vsub.f32 1.5, %v417_v48 }
 0x1b0   : > { %v419_v51 = vmul.f32 %v1651_v45, %v418_v49 }
 0x1b2   : > { %v423_v53 = vsel %vm422_vm5, %v1651_v45, %v419_v51 }
 0x1b3   : > { %v424_v54 = vmul.f32 %v423_v53, %v407_v33 }
 0x1b5   : > { %v426_v56 = vmul.f32 %v425_v52, %v424_v54 }
 0x1b7   : > { %v428_v57 = vadd.f32 %v427_v55, %v426_v56 }
 0x1b9   : > { %v429_v58 = vpack.c.bf16 %v428_v57, %v428_v57 }
 0x1bb   : > { %1469 = vmatmul.msk.bf16.vlgmr.msra.gmra.mxu2 %vm443_vm6, %v429_v58 }
 0x23e   : > { %v456_v60 = vpop.f32.mrf.mxu2 }
 0x23f   : > { %v457_v61 = vadd.f32 %v456_v60, %v430_v59 }
 0x241   : > { %v1841_v62 = vpack.c.bf16 %v457_v61, %v457_v61 }
 0x243   : > { %525 = vrot.lane.b32.xlu0 %v1841_v62, %s1706_s17  ;;  %497 = vrot.lane.b32.xlu2 %v1841_v62, %s1707_s18 }
 0x244   : > { %462 = vrot.lane.b32.xlu1 %v1841_v62, %s1708_s19 }
 0x246   : > { %v458_v63 = vpop.f32.mrf.mxu2 }
 0x24b   : > { %581 = vrot.lane.b32.xlu0 %v1841_v62, %s1709_s20  ;;  %523 = vrot.lane.b32.xlu2 %v1841_v62, %s1710_s23 }
 0x253   : > { %637 = vrot.lane.b32.xlu0 %v1841_v62, %s1711_s24  ;;  %579 = vrot.lane.b32.xlu2 %v1841_v62, %s1712_s25 }
 0x29d   : > { %v498_v3 = vpop.permute.xlu2 %497 }
 0x29e   : > { %v508_v4 = vand.u32 %v1857_v2, %v498_v3 }
 0x2a0   : > { %517 = vmatpush.bf16.msrb.mxu2 %v508_v4 }
 0x2a5   : > { %v524_v13 = vpop.permute.xlu2 %523 }
 0x2ad   : > { %v580_v32 = vpop.permute.xlu2 %579 }
 0x2b5   : > { %v526_v5 = vpop.permute.xlu0 %525 }
 0x2b6   : > { %v463_v6 = vpop.permute.xlu1 %462  ;;  %v531_v7 = vsel %vm464_vm9, %v526_v5, 0 }
 0x2b7   : > { %v469_v8 = vsel %vm464_vm9, %v463_v6, 0 }
 0x2b8   : > { %478 = vmatpush.bf16.xpose.msra.mxu3 %v469_v8 }
 0x2bd   : > { %v582_v9 = vpop.permute.xlu0 %581 }
 0x2be   : > { %v587_v10 = vsel %vm464_vm9, %v582_v9, 0 }
 0x2bf   : > { %1470 = vmatmul.msk.bf16.vlgmr.msra.gmra.mxu3 %vm464_vm9, %v1841_v62  ;;  %596 = vmatpush.bf16.xpose.msra.mxu2 %v587_v10 }
 0x2c0   : > { %540 = vmatpush.bf16.xpose.msrb.mxu3 %v531_v7 }
 0x2c5   : > { %v638_v11 = vpop.permute.xlu0 %637 }
 0x2c6   : > { %v643_v12 = vsel %vm464_vm9, %v638_v11, 0 }
 0x2c7   : > { %652 = vmatpush.bf16.xpose.msrb.mxu0 %v643_v12 }
 0x2cf   : > { %1472 = vmatmul.msk.bf16.vlgmr.msrb.gmra.mxu3 %vm464_vm9, %v524_v13 }
 0x342   : > { %v480_v14 = vpop.f32.mrf.mxu3 }
 0x343   : > { %v485_v15 = vsel %vm484_vm10, %v480_v14, -inf }
 0x344   : > { %486 = vmax.xlane.f32.xlu1 %v485_v15 }
 0x34a   : > { %v482_v16 = vpop.f32.mrf.mxu3 }
 0x352   : > { %v542_v17 = vpop.f32.mrf.mxu3 }
 0x353   : > { %v546_v18 = vsel %vm484_vm10, %v542_v17, -inf }
 0x354   : > { %547 = vmax.xlane.f32.xlu1 %v546_v18  ;;  %v1484_v18 = vld [vmem:[%s2140_s4 + $0x28] sm:$0xf] }
 0x35a   : > { %v544_v19 = vpop.f32.mrf.mxu3 }
 0x35b   : > { %v1609_v19 = vld [vmem:[%s2140_s4 + $0x34] sm:$0xf0] }
 0x3b7   : > { %v487_v20 = vpop.xlane.xlu1 %486 }
 0x3b8   : > { %v488_v22 = vsub.f32 %v480_v14, %v487_v20  ;;  %v1485_v20 = vor.u32 %v1609_v19, %v1484_v18 }
 0x3ba   : > { %v489_v23 = vmul.f32 1.442695, %v488_v22  ;;  %v1480_v22 = vld [vmem:[%s2140_s4 + $0x8] sm:$0xf] }
 0x3bc   : > { %1652 = vpow2.f32 %v489_v23  ;;  %v1605_v23 = vld [vmem:[%s2140_s4 + $0x14] sm:$0xf0] }
 0x3c2   : > { %v1653_v24 = vpop.eup %1652 }
 0x3c3   : > { %v491_v25 = vsel %vm484_vm10, %v1653_v24, 0.0 }
 0x3c4   : > { %492 = vadd.xlane.f32.xlu2 %v491_v25 }
 0x3c7   : > { %v548_v26 = vpop.xlane.xlu1 %547 }
 0x3c8   : > { %v549_v27 = vsub.f32 %v542_v17, %v548_v26 }
 0x3ca   : > { %v550_v28 = vmul.f32 1.442695, %v549_v27 }
 0x3cc   : > { %1654 = vpow2.f32 %v550_v28 }
 0x3d2   : > { %v1655_v29 = vpop.eup %1654 }
 0x3d3   : > { %v552_v31 = vsel %vm484_vm10, %v1655_v29, 0.0 }
 0x3d4   : > { %553 = vadd.xlane.f32.xlu1 %v552_v31 }
 0x3dc   : > { %635 = vrot.lane.b32.xlu2 %v1841_v62, %s1714_s26 }
 0x3ed   : > { %558 = vrot.lane.b32.xlu1 %v1841_v62, %s1715_s27 }
 0x437   : > { %v493_v33 = vpop.xlane.xlu2 %492 }
 0x438   : > { %1656 = vrcp.f32 %v493_v33  ;;  %v738_v33 = vperm.slane %v1835_v50, 3 }
 0x43e   : > { %v1657_v34 = vpop.eup %1656 }
 0x43f   : > { %v495_v35 = vmul.f32 %v1657_v34, %v1653_v24  ;;  %v636_v36 = vpop.permute.xlu2 %635  ;;  %v1481_v24 = vor.u32 %v1605_v23, %v1480_v22 }
 0x440   : > { %1476 = vmatmul.msk.bf16.vlgmr.msrb.gmra.mxu0 %vm464_vm9, %v636_v36 }
 0x441   : > { %v496_v37 = vpack.c.bf16 %v495_v35, %v495_v35 }
 0x443   : > { %1471 = vmatmul.msk.bf16.vlgmr.msrb.gmra.mxu2 %vm499_vm11, %v496_v37 }
 0x444   : > { %730 = vmatpush.bf16.msrb.mxu2 %v1485_v20 }
 0x447   : > { %v554_v38 = vpop.xlane.xlu1 %553 }
 0x448   : > { %1658 = vrcp.f32 %v554_v38  ;;  %731 = vmatpush.bf16.msrb.mxu2 %v1481_v24 }
 0x44e   : > { %v1659_v39 = vpop.eup %1658 }
 0x44f   : > { %v556_v40 = vmul.f32 %v1659_v39, %v1655_v29 }
 0x451   : > { %v557_v43 = vpack.c.bf16 %v556_v40, %v556_v40 }
 0x453   : > { %1474 = vmatmul.msk.bf16.vlgmr.msra.gmra.mxu2 %vm464_vm9, %v580_v32 }
 0x45f   : > { %v559_v41 = vpop.permute.xlu1 %558 }
 0x460   : > { %v564_v42 = vand.u32 %v559_v41, %v1857_v2 }
 0x462   : > { %573 = vmatpush.bf16.msrb.mxu1 %v564_v42 }
 0x465   : > { %1473 = vmatmul.msk.bf16.vlgmr.msrb.gmra.mxu1 %vm499_vm11, %v557_v43 }
 0x4bd   : > { %v654_v44 = vpop.f32.mrf.mxu0 }
 0x4be   : > { %v658_v45 = vsel %vm484_vm10, %v654_v44, -inf }
 0x4bf   : > { %659 = vmax.xlane.f32.xlu2 %v658_v45 }
 0x4c5   : > { %v656_v46 = vpop.f32.mrf.mxu0 }
 0x4c6   : > { %v1881_v47 = vpop.f32.mrf.mxu2  ;;  %v1602_v46 = vld [vmem:[%s2140_s4 + $0x4] sm:$0xf] }
 0x4ce   : > { %v521_v48 = vpop.f32.mrf.mxu2 }
 0x4d6   : > { %v598_v49 = vpop.f32.mrf.mxu2 }
 0x4d7   : > { %v602_v51 = vsel %vm484_vm10, %v598_v49, -inf }
 0x4d8   : > { %603 = vmax.xlane.f32.xlu0 %v602_v51 }
 0x4de   : > { %v600_v52 = vpop.f32.mrf.mxu2 }
 0x4e2   : > { %v575_v53 = vpop.f32.mrf.mxu1 }
 0x4ea   : > { %v577_v54 = vpop.f32.mrf.mxu1 }
 0x4ec   : > { %614 = vrot.lane.b32.xlu0 %v1841_v62, %s1716_s28 }
 0x4f4   : > { %692 = vrot.lane.b32.xlu0 %v575_v53, %s1717_s29 }
 0x532   : > { %v660_v55 = vpop.xlane.xlu2 %659 }
 0x533   : > { %v661_v56 = vsub.f32 %v654_v44, %v660_v55  ;;  %v1491_v44 = vld [vmem:[%s2140_s4 + $0x30] sm:$0xf0] }
 0x535   : > { %v662_v57 = vmul.f32 1.442695, %v661_v56 }
 0x537   : > { %1660 = vpow2.f32 %v662_v57 }
 0x53d   : > { %v1661_v58 = vpop.eup %1660 }
 0x53e   : > { %v664_v59 = vsel %vm484_vm10, %v1661_v58, 0.0 }
 0x53f   : > { %665 = vadd.xlane.f32.xlu2 %v664_v59  ;;  %v762_v59 = vperm.slane %v1835_v50, 4 }
 0x54b   : > { %v604_v60 = vpop.xlane.xlu0 %603 }
 0x54c   : > { %v605_v61 = vsub.f32 %v598_v49, %v604_v60 }
 0x54e   : > { %v606_v63 = vmul.f32 1.442695, %v605_v61 }
 0x550   : > { %1662 = vpow2.f32 %v606_v63  ;;  %v764_v63 = vperm.slane %v1835_v50, 5 }
 0x556   : > { %v1663_v0 = vpop.eup %1662 }
 0x557   : > { %670 = vrot.lane.b32.xlu2 %v1841_v62, %s1718_s30  ;;  %v608_v1 = vsel %vm484_vm10, %v1663_v0, 0.0 }
 0x558   : > { %609 = vadd.xlane.f32.xlu1 %v608_v1 }
 0x55e   : > { %v615_v3 = vpop.permute.xlu0 %614 }
 0x55f   : > { %v620_v4 = vand.u32 %v615_v3, %v1857_v2 }
 0x561   : > { %629 = vmatpush.bf16.msra.mxu3 %v620_v4  ;;  %v1611_v4 = vld [vmem:[%s2140_s4 + $0x6c] sm:$0xf] }
 0x566   : > { %v693_v25 = vpop.permute.xlu0 %692 }
 0x567   : > { %v703_v26 = vsel %vm464_vm9, %v1881_v47, %v693_v25  ;;  %v1487_v47 = vld [vmem:[%s2140_s4 + $0x10] sm:$0xf0] }
 0x568   : > { %v1490_v48 = vor.u32 %v1602_v46, %v1487_v47 }
 0x5b2   : > { %v666_v5 = vpop.xlane.xlu2 %665 }
 0x5b3   : > { %1664 = vrcp.f32 %v666_v5  ;;  %v1508_v5 = vld [vmem:[%s2140_s4 + $0x78] sm:$0xf0] }
 0x5b9   : > { %v1665_v6 = vpop.eup %1664 }
 0x5ba   : > { %v668_v7 = vmul.f32 %v1665_v6, %v1661_v58  ;;  %v671_v8 = vpop.permute.xlu2 %670  ;;  %v1511_v6 = vor.u32 %v1611_v4, %v1508_v5 }
 0x5bb   : > { %v676_v9 = vand.u32 %v671_v8, %v1857_v2  ;;  %v1504_v8 = vld [vmem:[%s2140_s4 + $0x58] sm:$0xf0] }
 0x5bc   : > { %v669_v10 = vpack.c.bf16 %v668_v7, %v668_v7  ;;  %829 = vmatpush.bf16.msra.mxu0 %v1511_v6  ;;  %v1610_v7 = vld [vmem:[%s2140_s4 + $0x4c] sm:$0xf] }
 0x5bd   : > { %685 = vmatpush.bf16.msra.mxu1 %v676_v9  ;;  %v1507_v9 = vor.u32 %v1610_v7, %v1504_v8 }
 0x5c0   : > { %1477 = vmatmul.msk.bf16.vlgmr.msra.gmra.mxu1 %vm499_vm11, %v669_v10  ;;  %v1607_v10 = vld [vmem:[%s2140_s4 + $0x2c] sm:$0xf]  ;;  %830 = vmatpush.bf16.msra.mxu0 %v1507_v9 }
 0x5cb   : > { %v610_v11 = vpop.xlane.xlu1 %609 }
 0x5cc   : > { %1666 = vrcp.f32 %v610_v11  ;;  %v1500_v11 = vld [vmem:[%s2140_s4 + $0x38] sm:$0xf0] }
 0x5d2   : > { %v1667_v62 = vpop.eup %1666 }
 0x5d3   : > { %v612_v12 = vmul.f32 %v1667_v62, %v1663_v0  ;;  %v1503_v62 = vor.u32 %v1607_v10, %v1500_v11 }
 0x5d5   : > { %v613_v13 = vpack.c.bf16 %v612_v12, %v612_v12  ;;  %v1603_v12 = vld [vmem:[%s2140_s4 + $0xc] sm:$0xf]  ;;  %831 = vmatpush.bf16.msra.mxu0 %v1503_v62 }
 0x5d7   : > { %1475 = vmatmul.msk.bf16.vlgmr.msra.gmra.mxu3 %vm499_vm11, %v613_v13  ;;  %v1496_v13 = vld [vmem:[%s2140_s4 + $0x18] sm:$0xf0] }
 0x63d   : > { %v687_v14 = vpop.f32.mrf.mxu1 }
 0x63e   : > { %700 = vrot.lane.b32.xlu2 %v687_v14, %s2144_s7  ;;  %v1499_v14 = vor.u32 %v1603_v12, %v1496_v13 }
 0x640   : > { %832 = vmatpush.bf16.msra.mxu0 %v1499_v14 }
 0x645   : > { %v689_v15 = vpop.f32.mrf.mxu1 }
 0x646   : > { %v767_v15 = vperm.slane %v1835_v50, 6 }
 0x65a   : > { %v631_v16 = vpop.f32.mrf.mxu3 }
 0x65b   : > { %696 = vrot.lane.b32.xlu0 %v631_v16, %s2143_s8 }
 0x662   : > { %v633_v17 = vpop.f32.mrf.mxu3 }
 0x698   : > { %v701_v28 = vpop.permute.xlu2 %700 }
 0x6cd   : > { %v697_v27 = vpop.permute.xlu0 %696 }
 0x6ce   : > { %v705_v29 = vsel %vm704_vm12, %v703_v26, %v697_v27 }
 0x6cf   : > { %v707_v31 = vsel %vm706_vm13, %v705_v29, %v701_v28 }
 0x6d0   : > { %v708_v32 = vpack.c.bf16 %v707_v31, %v707_v31  ;;  %v839_v31 = vperm.slane %v1835_v50, 7  ;;  %v1532_v50 = vld [vmem:[%s2140_s4 + $0xa0] sm:$0xf] }
 0x6d2   : > { %1486 = vmatmul.msk.bf16.vlgmr.msrb.gmra.mxu2 %vm443_vm6, %v708_v32 }
 0x755   : > { %v733_v34 = vpop.f32.mrf.mxu2 }
 0x756   : > { %v737_v35 = vadd.f32 %v733_v34, %v1810_v21  ;;  %v1606_v21 = vld [vmem:[%s2140_s4 + $0x24] sm:$0xf] }
 0x757   : > { %v1494_v45 = vor.u32 %v1606_v21, %v1491_v44  ;;  %v1528_v21 = vld [vmem:[%s2140_s4 + $0x80] sm:$0xf]  ;;  %v1614_v44 = vld [vmem:[%s2140_s4 + $0x8c] sm:$0xf0] }
 0x758   : > { %v1916_v36 = vadd.f32 %v738_v33, %v737_v35 }
 0x759   : > { %785 = vmatpush.bf16.msrb.mxu3 %v1494_v45  ;;  %v1529_v45 = vor.u32 %v1614_v44, %v1528_v21 }
 0x75a   : > { %v740_v37 = vsel %vm395_vm1, %v1916_v36, 0.0 }
 0x75b   : > { %741 = vadd.xlane.f32.xlu0 %v740_v37 }
 0x75d   : > { %v735_v38 = vpop.f32.mrf.mxu2  ;;  %786 = vmatpush.bf16.msrb.mxu3 %v1490_v48 }
 0x7ce   : > { %v742_v39 = vpop.xlane.xlu0 %741 }
 0x7cf   : > { %v743_v40 = vmul.f32 %v742_v39, %v1814_v30 }
 0x7d1   : > { %v744_v41 = vsub.f32 %v1916_v36, %v743_v40 }
 0x7d3   : > { %v745_v42 = vmul.f32 %v744_v41, %v744_v41 }
 0x7d5   : > { %v746_v43 = vsel %vm395_vm1, %v745_v42, 0.0 }
 0x7d6   : > { %747 = vadd.xlane.f32.xlu1 %v746_v43 }
 0x849   : > { %v748_v49 = vpop.xlane.xlu1 %747 }
 0x84a   : > { %v749_v51 = vmul.f32 %v748_v49, %v1814_v30 }
 0x84c   : > { %v750_v52 = vadd.f32 1e-12, %v749_v51 }
 0x84e   : > { %1668 = vrsqrt.f32 %v750_v52  ;;  %vm757_vm15 = vweird.f32 %v750_v52 }
 0x854   : > { %v1669_v53 = vpop.eup %1668 }
 0x855   : > { %v752_v54 = vmul.f32 %v1669_v53, %v750_v52  ;;  %vm758_vm14 = vweird.f32 %v1669_v53 }
 0x856   : > { %vm759_vm2 = vmor %vm757_vm15, %vm758_vm14 }
 0x857   : > { %v753_v55 = vmul.f32 %v1669_v53, %v752_v54  ;;  %v1990_v54 = vld [vmem:[%s2138_s2 + $0x8] sm:$0xff] }
 0x859   : > { %v754_v56 = vmul.f32 0.5, %v753_v55 }
 0x85b   : > { %v755_v57 = vsub.f32 1.5, %v754_v56 }
 0x85d   : > { %v756_v58 = vmul.f32 %v1669_v53, %v755_v57  ;;  %v878_v57 = vperm.slane %v1990_v54, 0 }
 0x85f   : > { %v760_v60 = vsel %vm759_vm2, %v1669_v53, %v756_v58 }
 0x860   : > { %v761_v61 = vmul.f32 %v760_v60, %v744_v41  ;;  %v880_v60 = vperm.slane %v1990_v54, 1 }
 0x862   : > { %v763_v0 = vmul.f32 %v762_v59, %v761_v61 }
 0x864   : > { %v765_v1 = vadd.f32 %v764_v63, %v763_v0 }
 0x866   : > { %v766_v3 = vpack.c.bf16 %v765_v1, %v765_v1  ;;  %v883_v1 = vperm.slane %v1990_v54, 2 }
 0x868   : > { %1495 = vmatmul.msk.bf16.vlgmr.msrb.gmra.mxu3 %vm443_vm6, %v766_v3 }
 0x8eb   : > { %v788_v16 = vpop.f32.mrf.mxu3 }
 0x8ec   : > { %v789_v17 = vadd.f32 %v788_v16, %v767_v15 }
 0x8ee   : > { %v793_v18 = vmul.f32 0.044715, %v789_v17  ;;  %v792_v26 = vmul.f32 0.5, %v789_v17 }
 0x8f0   : > { %v794_v19 = vmul.f32 %v793_v18, %v789_v17 }
 0x8f2   : > { %v795_v20 = vmul.f32 %v794_v19, %v789_v17 }
 0x8f3   : > { %v790_v22 = vpop.f32.mrf.mxu3 }
 0x8f4   : > { %v796_v23 = vadd.f32 %v795_v20, %v789_v17 }
 0x8f6   : > { %v797_v24 = vmul.f32 0.7978846, %v796_v23 }
 0x8f8   : > { %1670 = vtanh.f32 %v797_v24 }
 0x8fe   : > { %v1671_v25 = vpop.eup %1670 }
 0x8ff   : > { %v799_v27 = vadd.f32 1.0, %v1671_v25 }
 0x901   : > { %v800_v28 = vmul.f32 %v799_v27, %v792_v26 }
 0x903   : > { %v801_v29 = vpack.c.bf16 %v800_v28, %v800_v28 }
 0x905   : > { %1512 = vmatmul.msk.bf16.vlgmr.msra.gmra.mxu0 %vm352_vm0, %v801_v29 }
 0x982   : > { %v834_v32 = vpop.f32.mrf.mxu0 }
 0x983   : > { %v838_v33 = vadd.f32 %v834_v32, %v1916_v36  ;;  %v1618_v36 = vld [vmem:[%s2140_s4 + $0xac] sm:$0xf0] }
 0x984   : > { %v1533_v43 = vor.u32 %v1618_v36, %v1532_v50 }
 0x985   : > { %v1967_v34 = vadd.f32 %v839_v31, %v838_v33 }
 0x986   : > { %905 = vmatpush.bf16.msrb.mxu1 %v1533_v43 }
 0x987   : > { %v856_v35 = vsel %vm395_vm1, %v1967_v34, 0.0 }
 0x988   : > { %857 = vadd.xlane.f32.xlu2 %v856_v35 }
 0x98a   : > { %v836_v37 = vpop.f32.mrf.mxu0  ;;  %906 = vmatpush.bf16.msrb.mxu1 %v1529_v45 }
 0x9fb   : > { %v858_v38 = vpop.xlane.xlu2 %857 }
 0x9fc   : > { %v859_v39 = vmul.f32 %v858_v38, %v1814_v30 }
 0x9fe   : > { %v860_v40 = vsub.f32 %v1967_v34, %v859_v39 }
 0xa00   : > { %v861_v41 = vmul.f32 %v860_v40, %v860_v40 }
 0xa02   : > { %v862_v42 = vsel %vm395_vm1, %v861_v41, 0.0 }
 0xa03   : > { %863 = vadd.xlane.f32.xlu1 %v862_v42 }
 0xa76   : > { %v864_v46 = vpop.xlane.xlu1 %863 }
 0xa77   : > { %v865_v47 = vmul.f32 %v864_v46, %v1814_v30 }
 0xa79   : > { %v866_v48 = vadd.f32 1e-12, %v865_v47 }
 0xa7b   : > { %1672 = vrsqrt.f32 %v866_v48  ;;  %vm873_vm4 = vweird.f32 %v866_v48 }
 0xa81   : > { %v1673_v49 = vpop.eup %1672 }
 0xa82   : > { %v868_v51 = vmul.f32 %v1673_v49, %v866_v48  ;;  %vm874_vm3 = vweird.f32 %v1673_v49 }
 0xa83   : > { %vm875_vm5 = vmor %vm873_vm4, %vm874_vm3 }
 0xa84   : > { %v869_v52 = vmul.f32 %v1673_v49, %v868_v51 }
 0xa86   : > { %v870_v53 = vmul.f32 0.5, %v869_v52 }
 0xa88   : > { %v871_v55 = vsub.f32 1.5, %v870_v53 }
 0xa8a   : > { %v872_v56 = vmul.f32 %v1673_v49, %v871_v55 }
 0xa8c   : > { %v876_v58 = vsel %vm875_vm5, %v1673_v49, %v872_v56 }
 0xa8d   : > { %v877_v59 = vmul.f32 %v876_v58, %v860_v40 }
 0xa8f   : > { %v879_v61 = vmul.f32 %v878_v57, %v877_v59 }
 0xa91   : > { %v881_v63 = vadd.f32 %v880_v60, %v879_v61 }
 0xa93   : > { %v882_v0 = vpack.c.bf16 %v881_v63, %v881_v63 }
 0xa95   : > { %1534 = vmatmul.msk.bf16.vlgmr.msrb.gmra.mxu1 %vm443_vm6, %v882_v0 }
 0xb12   : > { %v908_v3 = vpop.f32.mrf.mxu1 }
 0xb13   : > { %v909_v4 = vadd.f32 %v908_v3, %v883_v1 }
 0xb15   : > { %v1996_v5 = vpack.c.bf16 %v909_v4, %v909_v4 }
 0xb17   : > { %968 = vrot.lane.b32.xlu2 %v1996_v5, %s1710_s23  ;;  %970 = vrot.lane.b32.xlu0 %v1996_v5, %s1706_s17  ;;  %s2145_s17 = smov 24  }
 0xb18   : > { %914 = vrot.lane.b32.xlu1 %v1996_v5, %s1708_s19 }
 0xb1a   : > { %v910_v6 = vpop.f32.mrf.mxu1 }
 0xb1f   : > { %1080 = vrot.lane.b32.xlu0 %v1996_v5, %s1714_s26 }
 0xb20   : > { %1026 = vrot.lane.b32.xlu1 %v1996_v5, %s1709_s20 }
 0xb28   : > { %1024 = vrot.lane.b32.xlu1 %v1996_v5, %s1712_s25 }
 0xb30   : > { %1082 = vrot.lane.b32.xlu1 %v1996_v5, %s1711_s24 }
 0xb71   : > { %v969_v11 = vpop.permute.xlu2 %968 }
 0xb89   : > { %v971_v7 = vpop.permute.xlu0 %970 }
 0xb8a   : > { %v976_v8 = vsel %vm464_vm9, %v971_v7, 0  ;;  %v915_v9 = vpop.permute.xlu1 %914 }
 0xb8b   : > { %v920_v10 = vsel %vm464_vm9, %v915_v9, 0  ;;  %985 = vmatpush.bf16.xpose.msrb.mxu0 %v976_v8 }
 0xb8c   : > { %929 = vmatpush.bf16.xpose.msra.mxu2 %v920_v10 }
 0xb91   : > { %v1081_v16 = vpop.permute.xlu0 %1080 }
 0xb92   : > { %v1027_v62 = vpop.permute.xlu1 %1026  ;;  %1537 = vmatmul.msk.bf16.vlgmr.msrb.gmra.mxu0 %vm464_vm9, %v969_v11 }
 0xb93   : > { %v1032_v12 = vsel %vm464_vm9, %v1027_v62, 0  ;;  %1535 = vmatmul.msk.bf16.vlgmr.msra.gmra.mxu2 %vm464_vm9, %v1996_v5 }
 0xb94   : > { %1041 = vmatpush.bf16.xpose.msrb.mxu2 %v1032_v12 }
 0xb9a   : > { %v1025_v13 = vpop.permute.xlu1 %1024 }
 0xba2   : > { %v1083_v14 = vpop.permute.xlu1 %1082 }
 0xba3   : > { %v1088_v15 = vsel %vm464_vm9, %v1083_v14, 0  ;;  %1539 = vmatmul.msk.bf16.vlgmr.msrb.gmra.mxu2 %vm464_vm9, %v1025_v13 }
 0xba4   : > { %1097 = vmatpush.bf16.xpose.msra.mxu0 %v1088_v15 }
 0xbab   : > { %1541 = vmatmul.msk.bf16.vlgmr.msra.gmra.mxu0 %vm464_vm9, %v1081_v16 }
 0xc0f   : > { %v987_v17 = vpop.f32.mrf.mxu0 }
 0xc10   : > { %v991_v18 = vsel %vm484_vm10, %v987_v17, -inf }
 0xc11   : > { %992 = vmax.xlane.f32.xlu0 %v991_v18 }
 0xc16   : > { %v931_v19 = vpop.f32.mrf.mxu2 }
 0xc17   : > { %v935_v20 = vsel %vm484_vm10, %v931_v19, -inf  ;;  %v989_v22 = vpop.f32.mrf.mxu0 }
 0xc18   : > { %936 = vmax.xlane.f32.xlu1 %v935_v20  ;;  %v1619_v22 = vld [vmem:[%s2140_s4 + $0xb4] sm:$0xf0] }
 0xc1e   : > { %v933_v23 = vpop.f32.mrf.mxu2 }
 0xc25   : > { %1003 = vrot.lane.b32.xlu0 %v1996_v5, %s1715_s27 }
 0xc26   : > { %v1043_v24 = vpop.f32.mrf.mxu2 }
 0xc27   : > { %v1047_v25 = vsel %vm484_vm10, %v1043_v24, -inf }
 0xc28   : > { %1048 = vmax.xlane.f32.xlu2 %v1047_v25  ;;  %v1099_v26 = vpop.f32.mrf.mxu0  ;;  %v1615_v25 = vld [vmem:[%s2140_s4 + $0x94] sm:$0xf0] }
 0xc29   : > { %v1103_v27 = vsel %vm484_vm10, %v1099_v26, -inf }
 0xc2a   : > { %1104 = vmax.xlane.f32.xlu1 %v1103_v27 }
 0xc2e   : > { %v1045_v28 = vpop.f32.mrf.mxu2 }
 0xc30   : > { %v1101_v29 = vpop.f32.mrf.mxu0 }
 0xc40   : > { %947 = vrot.lane.b32.xlu2 %v1996_v5, %s1707_s18  ;;  %s2146_s18 = smov 16  }
 0xc84   : > { %v993_v31 = vpop.xlane.xlu0 %992 }
 0xc85   : > { %v994_v32 = vsub.f32 %v987_v17, %v993_v31 }
 0xc87   : > { %v995_v33 = vmul.f32 1.442695, %v994_v32 }
 0xc89   : > { %1674 = vpow2.f32 %v995_v33 }
 0xc8b   : > { %v937_v35 = vpop.xlane.xlu1 %936 }
 0xc8c   : > { %v938_v37 = vsub.f32 %v931_v19, %v937_v35 }
 0xc8e   : > { %v939_v38 = vmul.f32 1.442695, %v938_v37  ;;  %v1181_v37 = vperm.slane %v1990_v54, 3 }
 0xc8f   : > { %v1675_v39 = vpop.eup %1674 }
 0xc90   : > { %1676 = vpow2.f32 %v939_v38  ;;  %v997_v40 = vsel %vm484_vm10, %v1675_v39, 0.0 }
 0xc91   : > { %998 = vadd.xlane.f32.xlu1 %v997_v40 }
 0xc96   : > { %v1677_v41 = vpop.eup %1676 }
 0xc97   : > { %v941_v42 = vsel %vm484_vm10, %v1677_v41, 0.0  ;;  %v1004_v50 = vpop.permute.xlu0 %1003 }
 0xc98   : > { %942 = vadd.xlane.f32.xlu0 %v941_v42  ;;  %v1009_v36 = vand.u32 %v1004_v50, %v1857_v2 }
 0xc9a   : > { %1018 = vmatpush.bf16.msra.mxu1 %v1009_v36 }
 0xc9b   : > { %v1049_v43 = vpop.xlane.xlu2 %1048 }
 0xc9c   : > { %v1050_v21 = vsub.f32 %v1043_v24, %v1049_v43  ;;  %v1545_v24 = vld [vmem:[%s2140_s4 + $0x88] sm:$0xf] }
 0xc9d   : > { %v1105_v44 = vpop.xlane.xlu1 %1104 }
 0xc9e   : > { %v1051_v45 = vmul.f32 1.442695, %v1050_v21  ;;  %v1106_v46 = vsub.f32 %v1099_v26, %v1105_v44  ;;  %v1546_v26 = vor.u32 %v1615_v25, %v1545_v24 }
 0xca0   : > { %1678 = vpow2.f32 %v1051_v45  ;;  %v1107_v47 = vmul.f32 1.442695, %v1106_v46  ;;  %v1556_v45 = vld [vmem:[%s2140_s4 + $0xb0] sm:$0xf0] }
 0xca2   : > { %1680 = vpow2.f32 %v1107_v47  ;;  %v1612_v47 = vld [vmem:[%s2140_s4 + $0x84] sm:$0xf] }
 0xca3   : > { %v948_v48 = vpop.permute.xlu2 %947 }
 0xca4   : > { %v953_v49 = vand.u32 %v948_v48, %v1857_v2  ;;  %v1552_v48 = vld [vmem:[%s2140_s4 + $0x90] sm:$0xf0] }
 0xca6   : > { %v1679_v51 = vpop.eup %1678  ;;  %962 = vmatpush.bf16.msra.mxu3 %v953_v49  ;;  %v1555_v49 = vor.u32 %v1612_v47, %v1552_v48 }
 0xca7   : > { %v1053_v52 = vsel %vm484_vm10, %v1679_v51, 0.0 }
 0xca8   : > { %v1681_v53 = vpop.eup %1680  ;;  %1054 = vadd.xlane.f32.xlu1 %v1053_v52 }
 0xca9   : > { %v1109_v55 = vsel %vm484_vm10, %v1681_v53, 0.0 }
 0xcaa   : > { %1110 = vadd.xlane.f32.xlu2 %v1109_v55 }
 0xcac   : > { %1115 = vrot.lane.b32.xlu0 %v1996_v5, %s1718_s30 }
 0xcc1   : > { %1059 = vrot.lane.b32.xlu1 %v1996_v5, %s1716_s28 }
 0xd04   : > { %v999_v56 = vpop.xlane.xlu1 %998 }
 0xd05   : > { %1682 = vrcp.f32 %v999_v56 }
 0xd0b   : > { %v1683_v57 = vpop.eup %1682  ;;  %v943_v58 = vpop.xlane.xlu0 %942 }
 0xd0c   : > { %v1001_v59 = vmul.f32 %v1683_v57, %v1675_v39  ;;  %1684 = vrcp.f32 %v943_v58 }
 0xd0e   : > { %v1002_v60 = vpack.c.bf16 %v1001_v59, %v1001_v59 }
 0xd10   : > { %1538 = vmatmul.msk.bf16.vlgmr.msra.gmra.mxu1 %vm499_vm11, %v1002_v60 }
 0xd12   : > { %v1685_v61 = vpop.eup %1684 }
 0xd13   : > { %v945_v63 = vmul.f32 %v1685_v61, %v1677_v41  ;;  %v1205_v61 = vperm.slane %v1990_v54, 4 }
 0xd15   : > { %v946_v0 = vpack.c.bf16 %v945_v63, %v945_v63 }
 0xd17   : > { %1536 = vmatmul.msk.bf16.vlgmr.msra.gmra.mxu3 %vm499_vm11, %v946_v0 }
 0xd1b   : > { %v1055_v7 = vpop.xlane.xlu1 %1054 }
 0xd1d   : > { %v1111_v1 = vpop.xlane.xlu2 %1110 }
 0xd1e   : > { %1686 = vrcp.f32 %v1111_v1  ;;  %v1116_v3 = vpop.permute.xlu0 %1115  ;;  %v1207_v1 = vperm.slane %v1990_v54, 5 }
 0xd1f   : > { %v1121_v4 = vand.u32 %v1116_v3, %v1857_v2  ;;  %1688 = vrcp.f32 %v1055_v7  ;;  %v1573_v7 = vld [vmem:[%s2140_s4 + $0xf8] sm:$0xf0] }
 0xd21   : > { %1130 = vmatpush.bf16.msrb.mxu1 %v1121_v4 }
 0xd24   : > { %v1687_v5 = vpop.eup %1686 }
 0xd25   : > { %v1113_v6 = vmul.f32 %v1687_v5, %v1681_v53  ;;  %v1689_v9 = vpop.eup %1688 }
 0xd26   : > { %v1057_v10 = vmul.f32 %v1689_v9, %v1679_v51  ;;  %v1620_v9 = vld [vmem:[%s2140_s4 + $0xcc] sm:$0xf] }
 0xd27   : > { %v1114_v8 = vpack.c.bf16 %v1113_v6, %v1113_v6  ;;  %v1621_v6 = vld [vmem:[%s2140_s4 + $0xec] sm:$0xf] }
 0xd28   : > { %v1058_v12 = vpack.c.bf16 %v1057_v10, %v1057_v10  ;;  %v1569_v10 = vld [vmem:[%s2140_s4 + $0xd8] sm:$0xf0] }
 0xd29   : > { %1542 = vmatmul.msk.bf16.vlgmr.msrb.gmra.mxu1 %vm499_vm11, %v1114_v8  ;;  %v1576_v8 = vor.u32 %v1621_v6, %v1573_v7 }
 0xd2b   : > { %1272 = vmatpush.bf16.msrb.mxu0 %v1576_v8 }
 0xd33   : > { %v1060_v11 = vpop.permute.xlu1 %1059 }
 0xd34   : > { %v1065_v62 = vand.u32 %v1060_v11, %v1857_v2  ;;  %v1549_v2 = vld [vmem:[%s2140_s4 + $0xa8] sm:$0xf]  ;;  %v1572_v11 = vor.u32 %v1620_v9, %v1569_v10 }
 0xd35   : > { %v1550_v23 = vor.u32 %v1619_v22, %v1549_v2 }
 0xd36   : > { %1074 = vmatpush.bf16.msrb.mxu3 %v1065_v62  ;;  %v1617_v62 = vld [vmem:[%s2140_s4 + $0xac] sm:$0xf]  ;;  %1273 = vmatpush.bf16.msrb.mxu0 %v1572_v11 }
 0xd37   : > { %1173 = vmatpush.bf16.msra.mxu2 %v1550_v23 }
 0xd39   : > { %1540 = vmatmul.msk.bf16.vlgmr.msrb.gmra.mxu3 %vm499_vm11, %v1058_v12  ;;  %v1565_v12 = vld [vmem:[%s2140_s4 + $0xb8] sm:$0xf0] }
 0xd3b   : > { %1174 = vmatpush.bf16.msra.mxu2 %v1546_v26 }
 0xd8d   : > { %v1020_v13 = vpop.f32.mrf.mxu1 }
 0xd8e   : > { %1137 = vrot.lane.b32.xlu0 %v1020_v13, %s1717_s29  ;;  %v1568_v13 = vor.u32 %v1617_v62, %v1565_v12 }
 0xd90   : > { %1274 = vmatpush.bf16.msrb.mxu0 %v1568_v13 }
 0xd95   : > { %v1022_v14 = vpop.f32.mrf.mxu1 }
 0xd96   : > { %v1613_v14 = vld [vmem:[%s2140_s4 + $0x8c] sm:$0xf] }
 0xd9a   : > { %v964_v15 = vpop.f32.mrf.mxu3 }
 0xda2   : > { %v966_v16 = vpop.f32.mrf.mxu3 }
 0xda6   : > { %v1132_v17 = vpop.f32.mrf.mxu1 }
 0xda7   : > { %1145 = vrot.lane.b32.xlu1 %v1132_v17, %s2145_s17  ;;  %v1210_v17 = vperm.slane %v1990_v54, 6 }
 0xdae   : > { %v1134_v18 = vpop.f32.mrf.mxu1 }
 0xdbc   : > { %v1076_v19 = vpop.f32.mrf.mxu3 }
 0xdbd   : > { %1141 = vrot.lane.b32.xlu0 %v1076_v19, %s2146_s18 }
 0xdc4   : > { %v1078_v20 = vpop.f32.mrf.mxu3 }
 0xe00   : > { %v1138_v27 = vpop.permute.xlu0 %1137 }
 0xe01   : > { %v1148_v28 = vsel %vm464_vm9, %v964_v15, %v1138_v27  ;;  %v1561_v15 = vld [vmem:[%s2140_s4 + $0x98] sm:$0xf0]  ;;  %vm1284_vm9 = vcmask 253952  }
 0xe02   : > { %v1564_v16 = vor.u32 %v1613_v14, %v1561_v15 }
 0xe04   : > { %1275 = vmatpush.bf16.msrb.mxu0 %v1564_v16 }
 0xe19   : > { %v1146_v31 = vpop.permute.xlu1 %1145 }
 0xe2f   : > { %v1142_v29 = vpop.permute.xlu0 %1141 }
 0xe30   : > { %v1149_v32 = vsel %vm704_vm12, %v1148_v28, %v1142_v29 }
 0xe31   : > { %v1150_v33 = vsel %vm706_vm13, %v1149_v32, %v1146_v31  ;;  %v1282_v32 = vperm.slane %v1990_v54, 7  ;;  %v1622_v54 = vld [vmem:[%s2141_s5] sm:$0xff] }
 0xe32   : > { %v1151_v35 = vpack.c.bf16 %v1150_v33, %v1150_v33 }
 0xe34   : > { %1551 = vmatmul.msk.bf16.vlgmr.msra.gmra.mxu2 %vm443_vm6, %v1151_v35 }
 0xeb7   : > { %v1176_v38 = vpop.f32.mrf.mxu2 }
 0xeb8   : > { %v1180_v39 = vadd.f32 %v1176_v38, %v1967_v34  ;;  %v1616_v34 = vld [vmem:[%s2140_s4 + $0xa4] sm:$0xf] }
 0xeb9   : > { %v1559_v46 = vor.u32 %v1616_v34, %v1556_v45 }
 0xeba   : > { %v2066_v40 = vadd.f32 %v1181_v37, %v1180_v39 }
 0xebb   : > { %1228 = vmatpush.bf16.msra.mxu3 %v1559_v46 }
 0xebc   : > { %v1183_v41 = vsel %vm395_vm1, %v2066_v40, 0.0 }
 0xebd   : > { %1184 = vadd.xlane.f32.xlu0 %v1183_v41 }
 0xebf   : > { %v1178_v42 = vpop.f32.mrf.mxu2  ;;  %1229 = vmatpush.bf16.msra.mxu3 %v1555_v49 }
 0xf30   : > { %v1185_v50 = vpop.xlane.xlu0 %1184 }
 0xf31   : > { %v1186_v36 = vmul.f32 %v1185_v50, %v1814_v30 }
 0xf33   : > { %v1187_v43 = vsub.f32 %v2066_v40, %v1186_v36 }
 0xf35   : > { %v1188_v21 = vmul.f32 %v1187_v43, %v1187_v43 }
 0xf37   : > { %v1189_v44 = vsel %vm395_vm1, %v1188_v21, 0.0  ;;  %v1623_v21 = vld [vmem:[%s2141_s5 + $0x8] sm:$0xff] }
 0xf38   : > { %1190 = vadd.xlane.f32.xlu1 %v1189_v44  ;;  %1342 = vmatpush.bf16.msra.mxu1 %v1623_v21 }
 0xf3c   : > { %1343 = vmatpush.bf16.msra.mxu1 %v1622_v54 }
 0xfab   : > { %v1191_v51 = vpop.xlane.xlu1 %1190 }
 0xfac   : > { %v1192_v52 = vmul.f32 %v1191_v51, %v1814_v30 }
 0xfae   : > { %v1193_v53 = vadd.f32 1e-12, %v1192_v52  ;;  %v1696_v52 = vld [vmem:[%s2137_s1] sm:$0xff] }
 0xfb0   : > { %1690 = vrsqrt.f32 %v1193_v53  ;;  %vm1200_vm7 = vweird.f32 %v1193_v53 }
 0xfb6   : > { %v1691_v55 = vpop.eup %1690 }
 0xfb7   : > { %v1195_v56 = vmul.f32 %v1691_v55, %v1193_v53  ;;  %vm1201_vm1 = vweird.f32 %v1691_v55  ;;  %v1308_v53 = vrot.slane %v1696_v52, 5 }
 0xfb8   : > { %vm1202_vm8 = vmor %vm1200_vm7, %vm1201_vm1 }
 0xfb9   : > { %v1196_v57 = vmul.f32 %v1691_v55, %v1195_v56  ;;  %v1311_v56 = vrot.slane %v1696_v52, 6 }
 0xfbb   : > { %v1197_v58 = vmul.f32 0.5, %v1196_v57 }
 0xfbd   : > { %v1198_v59 = vsub.f32 1.5, %v1197_v58 }
 0xfbf   : > { %v1199_v60 = vmul.f32 %v1691_v55, %v1198_v59 }
 0xfc1   : > { %v1203_v63 = vsel %vm1202_vm8, %v1691_v55, %v1199_v60  ;;  %v1331_v60 = vrot.slane %v1696_v52, 7 }
 0xfc2   : > { %v1204_v0 = vmul.f32 %v1203_v63, %v1187_v43 }
 0xfc4   : > { %v1206_v3 = vmul.f32 %v1205_v61, %v1204_v0 }
 0xfc6   : > { %v1208_v4 = vadd.f32 %v1207_v1, %v1206_v3 }
 0xfc8   : > { %v1209_v5 = vpack.c.bf16 %v1208_v4, %v1208_v4 }
 0xfca   : > { %1560 = vmatmul.msk.bf16.vlgmr.msra.gmra.mxu3 %vm443_vm6, %v1209_v5 }
0x104d   : > { %v1231_v18 = vpop.f32.mrf.mxu3 }
0x104e   : > { %v1232_v19 = vadd.f32 %v1231_v18, %v1210_v17 }
0x1050   : > { %v1236_v20 = vmul.f32 0.044715, %v1232_v19  ;;  %v1235_v27 = vmul.f32 0.5, %v1232_v19 }
0x1052   : > { %v1237_v2 = vmul.f32 %v1236_v20, %v1232_v19 }
0x1054   : > { %v1238_v22 = vmul.f32 %v1237_v2, %v1232_v19 }
0x1055   : > { %v1233_v23 = vpop.f32.mrf.mxu3 }
0x1056   : > { %v1239_v24 = vadd.f32 %v1238_v22, %v1232_v19 }
0x1058   : > { %v1240_v25 = vmul.f32 0.7978846, %v1239_v24 }
0x105a   : > { %1692 = vtanh.f32 %v1240_v25 }
0x1060   : > { %v1693_v26 = vpop.eup %1692 }
0x1061   : > { %v1242_v28 = vadd.f32 1.0, %v1693_v26 }
0x1063   : > { %v1243_v29 = vmul.f32 %v1242_v28, %v1235_v27 }
0x1065   : > { %v1244_v31 = vpack.c.bf16 %v1243_v29, %v1243_v29 }
0x1067   : > { %1577 = vmatmul.msk.bf16.vlgmr.msrb.gmra.mxu0 %vm352_vm0, %v1244_v31 }
0x10e4   : > { %v1277_v33 = vpop.f32.mrf.mxu0 }
0x10e5   : > { %v1281_v35 = vadd.f32 %v1277_v33, %v2066_v40 }
0x10e7   : > { %v1283_v37 = vadd.f32 %v1282_v32, %v1281_v35 }
0x10e9   : > { %v1285_v38 = vsel %vm1284_vm9, %v1283_v37, 0.0 }
0x10ea   : > { %1286 = vadd.xlane.f32.xlu2 %v1285_v38 }
0x10ec   : > { %v1279_v39 = vpop.f32.mrf.mxu0 }
0x115d   : > { %v1287_v41 = vpop.xlane.xlu2 %1286 }
0x115e   : > { %v1288_v42 = vmul.f32 %v1287_v41, %v1814_v30 }
0x1160   : > { %v1289_v50 = vsub.f32 %v1283_v37, %v1288_v42 }
0x1162   : > { %v1290_v36 = vmul.f32 %v1289_v50, %v1289_v50 }
0x1164   : > { %v1291_v43 = vsel %vm1284_vm9, %v1290_v36, 0.0 }
0x1165   : > { %1292 = vadd.xlane.f32.xlu2 %v1291_v43 }
0x11d8   : > { %v1293_v40 = vpop.xlane.xlu2 %1292 }
0x11d9   : > { %v1294_v44 = vmul.f32 %v1293_v40, %v1814_v30 }
0x11db   : > { %v1295_v34 = vadd.f32 1e-12, %v1294_v44 }
0x11dd   : > { %1694 = vrsqrt.f32 %v1295_v34  ;;  %vm1302_vm10 = vweird.f32 %v1295_v34 }
0x11e3   : > { %v1695_v45 = vpop.eup %1694 }
0x11e4   : > { %v1297_v46 = vmul.f32 %v1695_v45, %v1295_v34  ;;  %vm1303_vm0 = vweird.f32 %v1695_v45 }
0x11e5   : > { %vm1304_vm11 = vmor %vm1302_vm10, %vm1303_vm0 }
0x11e6   : > { %v1298_v47 = vmul.f32 %v1695_v45, %v1297_v46 }
0x11e8   : > { %v1299_v48 = vmul.f32 0.5, %v1298_v47 }
0x11ea   : > { %v1300_v49 = vsub.f32 1.5, %v1299_v48 }
0x11ec   : > { %v1301_v51 = vmul.f32 %v1695_v45, %v1300_v49 }
0x11ee   : > { %v1305_v55 = vsel %vm1304_vm11, %v1695_v45, %v1301_v51 }
0x11ef   : > { %v1306_v30 = vmul.f32 %v1305_v55, %v1289_v50 }
0x11f1   : > { %v1310_v57 = vmul.f32 %v1308_v53, %v1306_v30 }
0x11f3   : > { %v1313_v58 = vadd.f32 %v1311_v56, %v1310_v57 }
0x11f5   : > { %v1314_v59 = vpack.c.bf16 %v1313_v58, %v1313_v58 }
0x11f7   : > { %1586 = vmatmul.msk.bf16.vlgmr.msra.gmra.mxu1 %vm443_vm6, %v1314_v59 }
0x1274   : > { %v1345_v61 = vpop.f32.mrf.mxu1 }
0x1275   : > { %v1346_v63 = vadd.f32 %v1345_v61, %v1331_v60 }
0x1277   : > { %v1349_v0 = vperm.slane %v1346_v63, 0 }
0x1279   : > { %1350 = vst [vmem:[%s249_s14] sm:$0xff] %v1349_v0 }
0x127c   : > { %v1347_v1 = vpop.f32.mrf.mxu1 }
0x127d PF: > { %s16_s21 = sadd.s32 1, %s1703_s21  }
0x127e   : > { %p13_p4 = scmp.ge.s32.totalorder %s16_s21, 4  }
0x1280   :  { %15 = sbr.rel (!%p13_p4) target bundleno = 1 (0x1), region = 76 }

</bundles_post_ra>
